<compile_context>
chip_gen: v6e
topology: v6e:2x2x1
jax: 0.10.0
libtpu: 0.0.40
codegen_flags: <defaults>
</compile_context>

<pallas_src>
import jax
import jax.numpy as jnp
from jax.experimental import pallas as pl
from jax.experimental.pallas import tpu as pltpu


_VMEM_LIMIT_BYTES = 32 * 1024 * 1024        # safe scoped-VMEM limit on v5e/v6e/v7x
_EMB_TILE_BUDGET_BYTES = 8 * 1024 * 1024    # 2 emb streams x 2 pipeline buffers


# ------------------------------ helpers -------------------------------------

def _round_up(x, m):
    return (x + m - 1) // m * m


def _bf16(x):
    return x.astype(jnp.bfloat16)


def _erf_gelu(x):
    # exact (erf) GELU, matching torch.nn.functional.gelu default
    return 0.5 * x * (1.0 + jax.lax.erf(x * (1.0 / jnp.sqrt(2.0).astype(x.dtype))))


def _pick_tile_m(L, hidden):
    """Largest TM (multiple of 16) whose double-buffered bf16 embedding streams
    fit the per-step VMEM budget (keeps the 2-deep pipeline alive on v7x)."""
    per_row = 2 * 2 * L * hidden * 2        # 2 streams x 2 buffers x bf16 bytes
    tm = max(16, (_EMB_TILE_BUDGET_BYTES // per_row) // 16 * 16)
    return min(tm, 512)


# ----------------------------- Pallas kernels ------------------------------

def _news_encoder_kernel(temb_ref, tmask_ref, semb_ref, smask_ref,
                         w_ref, b_ref, out_ref):
    """Fused NewsEncoder tail for one tile of TM news rows.

    temb/semb  : (TM, L, hidden) bf16 token embeddings (backbone stand-in)
    tmask/smask: (TM, L) int32 attention masks
    w          : (2*hidden, D) bf16 folded weight [Wr@Wc1 ; Wr@Wc2]
    b          : (1, D) f32 folded bias
    out        : (TM, D) bf16
    """
    def pool(emb_ref, m_ref):
        m = m_ref[...].astype(jnp.float32)                              # (TM, L)
        summed = jnp.sum(emb_ref[...].astype(jnp.float32) * m[..., None],
                         axis=1)                                        # f32 accum
        denom = jnp.maximum(jnp.sum(m, axis=1, keepdims=True), 1.0)
        return summed / denom                                           # (TM, hidden)

    pooled = jnp.concatenate([pool(temb_ref, tmask_ref),
                              pool(semb_ref, smask_ref)], axis=-1)      # (TM, 2*hidden)
    out = jnp.dot(_bf16(pooled), w_ref[...],
                  preferred_element_type=jnp.float32) + b_ref[...]
    out_ref[...] = out.astype(out_ref.dtype)


def _miner_kernel(mask_ref, hist_ref, cand_ref, hcat_ref, ccat_ref,
                  wp_ref, cc_ref, wt_ref, mui_ref, score_ref):
    """Miner core for ONE batch row (grid over B, 'parallel').

    mask: (1,1,H) int32, hist: (1,H,D) bf16, cand: (1,N,D) bf16,
    hcat: (1,H,Ec) f32, ccat: (1,N,Ec) f32,
    wp: (D,C) bf16, cc: (K,C) bf16, wt: (D,D) bf16
    outputs: mui (1,1,K*D) f32 lane-dense slab, scores (1,1,N) f32
    """
    hist = hist_ref[0]            # (H, D) bf16
    cand = cand_ref[0]            # (N, D) bf16
    hcat = hcat_ref[0]            # (H, Ec) f32
    ccat = ccat_ref[0]            # (N, Ec) f32
    mask = mask_ref[0]            # (1, H) int32
    K = cc_ref.shape[0]
    D = hist.shape[1]
    N = cand.shape[0]

    # --- category bias (kept in f32), algebraically reduced over candidates:
    #     mean_n cos(h, c_n) = h_normalized . mean_n(c_normalized)
    h_inv = jax.lax.rsqrt(jnp.maximum(jnp.sum(hcat * hcat, -1, keepdims=True), 1e-24))
    c_inv = jax.lax.rsqrt(jnp.maximum(jnp.sum(ccat * ccat, -1, keepdims=True), 1e-24))
    c_mean = jnp.mean(ccat * c_inv, axis=0, keepdims=True)              # (1, Ec)
    bias_row = jax.lax.dot_general(c_mean, hcat * h_inv,
                                   (((1,), (1,)), ((), ())),
                                   preferred_element_type=jnp.float32)  # (1, H)

    # --- PolyAttention, logits directly in (K, H) layout (H on lanes) ---
    proj = jnp.tanh(jnp.dot(hist, wp_ref[...],
                            preferred_element_type=jnp.float32))        # (H, C) f32
    logits = jax.lax.dot_general(cc_ref[...], _bf16(proj),
                                 (((1,), (1,)), ((), ())),
                                 preferred_element_type=jnp.float32)    # (K, H)
    logits = logits + bias_row
    # masked_fill(~attn_mask, 1e-30) exactly as in the PyTorch reference
    logits = jnp.where(mask != 0, logits, 1e-30)
    w = jax.nn.softmax(logits, axis=-1)                                 # softmax over H

    mui = jnp.dot(_bf16(w), hist, preferred_element_type=jnp.float32)   # (K, D) f32
    mui_ref[...] = mui.reshape(1, 1, K * D)                             # lane-dense store

    # --- matching + TargetAwareAttention (score_type='weighted'), (K, N) layout
    mui_bf = _bf16(mui)
    matching = jax.lax.dot_general(mui_bf, cand, (((1,), (1,)), ((), ())),
                                   preferred_element_type=jnp.float32)  # (K, N)
    proj_t = _erf_gelu(jnp.dot(mui_bf, wt_ref[...],
                               preferred_element_type=jnp.float32))     # (K, D) f32
    attn_logits = jax.lax.dot_general(_bf16(proj_t), cand,
                                      (((1,), (1,)), ((), ())),
                                      preferred_element_type=jnp.float32)  # (K, N)
    attn = jax.nn.softmax(attn_logits, axis=0)                          # softmax over K
    score_ref[...] = jnp.sum(attn * matching, axis=0,
                             keepdims=True).reshape(1, 1, N)            # lane-dense (1,N)


# ------------------------------- wrappers -----------------------------------

def _fold_encoder_params(params):
    """Fold reduce_dim + linear_combine into one (2*hidden, D) contraction."""
    w_t = params["W_reduce"] @ params["W_comb1"]
    w_s = params["W_reduce"] @ params["W_comb2"]
    b_enc = (params["b_reduce"] @ params["W_comb1"]
             + params["b_reduce"] @ params["W_comb2"] + params["b_comb"])
    return {
        "token_embed_bf16": params["token_embed"].astype(jnp.bfloat16),
        "W_enc": jnp.concatenate([w_t, w_s], axis=0).astype(jnp.bfloat16),
        "b_enc": b_enc.astype(jnp.float32),
    }


def news_encoder_all(enc_params, title_tok, title_mask, sapo_tok, sapo_mask):
    """NewsEncoder forward for a stack of M news items, gridded over M."""
    # TODO(synk): the RobertaModel backbone has no clean single-kernel Pallas
    # equivalent; it is replaced by a bf16 token-embedding lookup (XLA gather)
    # plus a masked mean pooling (fused into the kernel) as the "[CLS]" stand-in.
    # TODO(synk): the gather could be fused in-kernel via PrefetchScalarGridSpec
    # (token ids as scalar prefetch, token_embed in pl.ANY) to drop the HBM
    # round trip of the (M, L, hidden) slabs.
    emb_tbl = enc_params["token_embed_bf16"]
    t_emb = jnp.take(emb_tbl, title_tok, axis=0)     # (M, L, hidden) bf16
    s_emb = jnp.take(emb_tbl, sapo_tok, axis=0)      # (M, L, hidden) bf16

    M, L = title_tok.shape
    hidden = emb_tbl.shape[1]
    D = enc_params["W_enc"].shape[1]

    TM = min(_pick_tile_m(L, hidden), _round_up(M, 8))
    M_pad = _round_up(M, TM)
    t_mask = title_mask.astype(jnp.int32)
    s_mask = sapo_mask.astype(jnp.int32)
    if M_pad != M:
        pad = M_pad - M
        t_emb = jnp.pad(t_emb, ((0, pad), (0, 0), (0, 0)))
        s_emb = jnp.pad(s_emb, ((0, pad), (0, 0), (0, 0)))
        t_mask = jnp.pad(t_mask, ((0, pad), (0, 0)))
        s_mask = jnp.pad(s_mask, ((0, pad), (0, 0)))

    out = pl.pallas_call(
        _news_encoder_kernel,
        grid=(M_pad // TM,),
        in_specs=[
            pl.BlockSpec((TM, L, hidden), lambda i: (i, 0, 0)),
            pl.BlockSpec((TM, L), lambda i: (i, 0)),
            pl.BlockSpec((TM, L, hidden), lambda i: (i, 0, 0)),
            pl.BlockSpec((TM, L), lambda i: (i, 0)),
            pl.BlockSpec((2 * hidden, D), lambda i: (0, 0)),
            pl.BlockSpec((1, D), lambda i: (0, 0)),
        ],
        out_specs=pl.BlockSpec((TM, D), lambda i: (i, 0)),
        out_shape=jax.ShapeDtypeStruct((M_pad, D), jnp.bfloat16),
        compiler_params=pltpu.CompilerParams(
            dimension_semantics=("parallel",),
            vmem_limit_bytes=_VMEM_LIMIT_BYTES),
    )(t_emb, t_mask, s_emb, s_mask, enc_params["W_enc"], enc_params["b_enc"])
    return out[:M]                                   # (M, D) bf16


def miner_core(hist_repr, cand_repr, his_mask, his_cat, cand_cat, wp, cc, wt):
    """Miner user-encoding + scoring, gridded over the batch (parallel)."""
    B, H, D = hist_repr.shape
    N = cand_repr.shape[1]
    K, C = cc.shape
    Ec = his_cat.shape[-1]
    mask3 = his_mask.astype(jnp.int32).reshape(B, 1, H)

    mui2d, scores = pl.pallas_call(
        _miner_kernel,
        grid=(B,),
        in_specs=[
            pl.BlockSpec((1, 1, H), lambda b: (b, 0, 0)),
            pl.BlockSpec((1, H, D), lambda b: (b, 0, 0)),
            pl.BlockSpec((1, N, D), lambda b: (b, 0, 0)),
            pl.BlockSpec((1, H, Ec), lambda b: (b, 0, 0)),
            pl.BlockSpec((1, N, Ec), lambda b: (b, 0, 0)),
            pl.BlockSpec((D, C), lambda b: (0, 0)),
            pl.BlockSpec((K, C), lambda b: (0, 0)),
            pl.BlockSpec((D, D), lambda b: (0, 0)),
        ],
        out_specs=(
            pl.BlockSpec((1, 1, K * D), lambda b: (b, 0, 0)),
            pl.BlockSpec((1, 1, N), lambda b: (b, 0, 0)),
        ),
        out_shape=(jax.ShapeDtypeStruct((B, 1, K * D), jnp.float32),
                   jax.ShapeDtypeStruct((B, 1, N), jnp.float32)),
        compiler_params=pltpu.CompilerParams(
            dimension_semantics=("parallel",)),
    )(mask3, hist_repr, cand_repr, his_cat, cand_cat,
      _bf16(wp), _bf16(cc), _bf16(wt))
    return mui2d.reshape(B, K, D), scores.reshape(B, N)


def miner_forward(params, title, title_mask, his_title, his_title_mask, his_mask,
                  sapo, sapo_mask, his_sapo, his_sapo_mask, category, his_category):
    B, N, L = title.shape
    H = his_title.shape[1]
    D = params["W_reduce"].shape[1]

    enc_params = _fold_encoder_params(params)

    # Merge candidate and history rows into a single encoder launch.
    all_title = jnp.concatenate(
        [title.reshape(B * N, L), his_title.reshape(B * H, L)], axis=0)
    all_title_mask = jnp.concatenate(
        [title_mask.reshape(B * N, L), his_title_mask.reshape(B * H, L)], axis=0)
    all_sapo = jnp.concatenate(
        [sapo.reshape(B * N, L), his_sapo.reshape(B * H, L)], axis=0)
    all_sapo_mask = jnp.concatenate(
        [sapo_mask.reshape(B * N, L), his_sapo_mask.reshape(B * H, L)], axis=0)

    news_repr = news_encoder_all(enc_params, all_title, all_title_mask,
                                 all_sapo, all_sapo_mask)            # (B*(N+H), D) bf16
    cand_repr = news_repr[:B * N].reshape(B, N, D)
    hist_repr = news_repr[B * N:].reshape(B, H, D)

    # category embedding lookups (dropout = identity at inference), kept f32
    his_cat = jnp.take(params["cat_embed"], his_category, axis=0)    # (B, H, Ec)
    cand_cat = jnp.take(params["cat_embed"], category, axis=0)       # (B, N, Ec)

    multi_user_interest, matching_scores = miner_core(
        hist_repr, cand_repr, his_mask, his_cat, cand_cat,
        params["W_poly"], params["context_codes"], params["W_target"])
    return multi_user_interest, matching_scores


# ------------------------------ parameters -----------------------------------

def init_params(key, vocab=50, hidden=64, D=32, C=32, K=4, num_cat=10, Ec=16):
    ks = jax.random.split(key, 8)
    p = {
        "token_embed": 0.02 * jax.random.normal(ks[0], (vocab, hidden), jnp.float32),
        "W_reduce": 0.1 * jax.random.normal(ks[1], (hidden, D), jnp.float32),
        "b_reduce": jnp.zeros((1, D), jnp.float32),
        "W_comb1": 0.1 * jax.random.normal(ks[2], (D, D), jnp.float32),
        "W_comb2": 0.1 * jax.random.normal(ks[3], (D, D), jnp.float32),
        "b_comb": jnp.zeros((1, D), jnp.float32),
        "W_poly": 0.1 * jax.random.normal(ks[4], (D, C), jnp.float32),
        "context_codes": 0.1 * jax.random.normal(ks[5], (K, C), jnp.float32),
        "W_target": 0.1 * jax.random.normal(ks[6], (D, D), jnp.float32),
    }
    cat = 0.1 * jax.random.normal(ks[7], (num_cat, Ec), jnp.float32)
    p["cat_embed"] = cat.at[0].set(0.0)   # padding_idx = 0
    return p


# --------------------------------- main --------------------------------------

if __name__ == "__main__":
    key = jax.random.PRNGKey(0)
    B, N, H, L = 2, 4, 8, 8           # batch, candidates, clicked-news, seq len
    K, D = 4, 32                      # context codes, embed dim

    kk = jax.random.split(key, 8)
    params = init_params(kk[0])

    title = jax.random.randint(kk[1], (B, N, L), 1, 50)
    title_mask = jnp.ones((B, N, L), jnp.int32)
    his_title = jax.random.randint(kk[2], (B, H, L), 1, 50)
    his_title_mask = jnp.ones((B, H, L), jnp.int32)
    his_mask = jnp.concatenate(
        [jnp.ones((B, H - 2), jnp.bool_), jnp.zeros((B, 2), jnp.bool_)], axis=1)
    sapo = jax.random.randint(kk[3], (B, N, L), 1, 50)
    sapo_mask = jnp.ones((B, N, L), jnp.int32)
    his_sapo = jax.random.randint(kk[4], (B, H, L), 1, 50)
    his_sapo_mask = jnp.ones((B, H, L), jnp.int32)
    category = jax.random.randint(kk[5], (B, N), 1, 10)        # avoid pad id 0
    his_category = jax.random.randint(kk[6], (B, H), 1, 10)

    mui, scores = miner_forward(params, title, title_mask, his_title,
                                his_title_mask, his_mask, sapo, sapo_mask,
                                his_sapo, his_sapo_mask, category, his_category)
    jax.block_until_ready((mui, scores))

    assert mui.shape == (B, K, D), mui.shape
    assert scores.shape == (B, N), scores.shape
    assert bool(jnp.all(jnp.isfinite(mui))) and bool(jnp.all(jnp.isfinite(scores)))
    print("KERNEL_OK")
</pallas_src>

<mosaic_0001>
module attributes {stable_mosaic.version = 11 : i64} {
  func.func @_news_encoder_kernel(%arg0: i32, %arg1: memref<24x8x64xbf16, #tpu.memory_space<vmem>>, %arg2: memref<24x8xi32, #tpu.memory_space<vmem>>, %arg3: memref<24x8x64xbf16, #tpu.memory_space<vmem>>, %arg4: memref<24x8xi32, #tpu.memory_space<vmem>>, %arg5: memref<128x32xbf16, #tpu.memory_space<vmem>>, %arg6: memref<1x32xf32, #tpu.memory_space<vmem>>, %arg7: memref<24x32xbf16, #tpu.memory_space<vmem>>) attributes {dimension_semantics = [#tpu.dimension_semantics<parallel>], iteration_bounds = array<i64: 1>, scalar_prefetch = 0 : i64, scratch_operands = 0 : i64, tpu.core_type = #tpu.core_type<tc>, window_params = [{transform_indices = @transform_0, window_bounds = array<i64: 24, 8, 64>}, {transform_indices = @transform_1, window_bounds = array<i64: 24, 8>}, {transform_indices = @transform_2, window_bounds = array<i64: 24, 8, 64>}, {transform_indices = @transform_3, window_bounds = array<i64: 24, 8>}, {pipeline_mode = #tpu.pipeline_mode<synchronous>, transform_indices = @transform_4, window_bounds = array<i64: 128, 32>}, {pipeline_mode = #tpu.pipeline_mode<synchronous>, transform_indices = @transform_5, window_bounds = array<i64: 1, 32>}, {transform_indices = @transform_6, window_bounds = array<i64: 24, 32>}]} {
    %c0 = arith.constant 0 : index
    %c0_0 = arith.constant 0 : index
    %0 = vector.load %arg2[%c0, %c0_0] : memref<24x8xi32, #tpu.memory_space<vmem>>, vector<24x8xi32>
    %1 = arith.sitofp %0 : vector<24x8xi32> to vector<24x8xf32>
    %c0_1 = arith.constant 0 : index
    %c0_2 = arith.constant 0 : index
    %c0_3 = arith.constant 0 : index
    %2 = vector.load %arg1[%c0_1, %c0_2, %c0_3] : memref<24x8x64xbf16, #tpu.memory_space<vmem>>, vector<24x8x64xbf16>
    %3 = arith.extf %2 : vector<24x8x64xbf16> to vector<24x8x64xf32>
    %4 = vector.shape_cast %1 : vector<24x8xf32> to vector<24x8x1xf32>
    %5 = vector.broadcast %4 : vector<24x8x1xf32> to vector<24x8x64xf32>
    %6 = arith.mulf %3, %5 : vector<24x8x64xf32>
    %cst = arith.constant dense<0.000000e+00> : vector<24x64xf32>
    %7 = vector.multi_reduction <add>, %6, %cst [1] : vector<24x8x64xf32> to vector<24x64xf32>
    %cst_4 = arith.constant dense<0.000000e+00> : vector<24xf32>
    %8 = vector.multi_reduction <add>, %1, %cst_4 [1] : vector<24x8xf32> to vector<24xf32>
    %9 = vector.shape_cast %8 : vector<24xf32> to vector<24x1xf32>
    %cst_5 = arith.constant 1.000000e+00 : f32
    %10 = vector.broadcast %cst_5 : f32 to vector<24x1xf32>
    %11 = arith.maximumf %9, %10 : vector<24x1xf32>
    %12 = vector.broadcast %11 : vector<24x1xf32> to vector<24x64xf32>
    %13 = arith.divf %7, %12 : vector<24x64xf32>
    %c0_6 = arith.constant 0 : index
    %c0_7 = arith.constant 0 : index
    %14 = vector.load %arg4[%c0_6, %c0_7] : memref<24x8xi32, #tpu.memory_space<vmem>>, vector<24x8xi32>
    %15 = arith.sitofp %14 : vector<24x8xi32> to vector<24x8xf32>
    %c0_8 = arith.constant 0 : index
    %c0_9 = arith.constant 0 : index
    %c0_10 = arith.constant 0 : index
    %16 = vector.load %arg3[%c0_8, %c0_9, %c0_10] : memref<24x8x64xbf16, #tpu.memory_space<vmem>>, vector<24x8x64xbf16>
    %17 = arith.extf %16 : vector<24x8x64xbf16> to vector<24x8x64xf32>
    %18 = vector.shape_cast %15 : vector<24x8xf32> to vector<24x8x1xf32>
    %19 = vector.broadcast %18 : vector<24x8x1xf32> to vector<24x8x64xf32>
    %20 = arith.mulf %17, %19 : vector<24x8x64xf32>
    %cst_11 = arith.constant dense<0.000000e+00> : vector<24x64xf32>
    %21 = vector.multi_reduction <add>, %20, %cst_11 [1] : vector<24x8x64xf32> to vector<24x64xf32>
    %cst_12 = arith.constant dense<0.000000e+00> : vector<24xf32>
    %22 = vector.multi_reduction <add>, %15, %cst_12 [1] : vector<24x8xf32> to vector<24xf32>
    %23 = vector.shape_cast %22 : vector<24xf32> to vector<24x1xf32>
    %cst_13 = arith.constant 1.000000e+00 : f32
    %24 = vector.broadcast %cst_13 : f32 to vector<24x1xf32>
    %25 = arith.maximumf %23, %24 : vector<24x1xf32>
    %26 = vector.broadcast %25 : vector<24x1xf32> to vector<24x64xf32>
    %27 = arith.divf %21, %26 : vector<24x64xf32>
    %28 = tpu.concatenate %13, %27 in 1 : vector<24x64xf32>, vector<24x64xf32> -> vector<24x128xf32>
    %29 = arith.truncf %28 : vector<24x128xf32> to vector<24x128xbf16>
    %c0_14 = arith.constant 0 : index
    %c0_15 = arith.constant 0 : index
    %30 = vector.load %arg5[%c0_14, %c0_15] : memref<128x32xbf16, #tpu.memory_space<vmem>>, vector<128x32xbf16>
    %cst_16 = arith.constant dense<0.000000e+00> : vector<24x32xf32>
    %31 = tpu.matmul %29, %30, %cst_16 {dimension_numbers = #tpu.dot_dimension_numbers<[1], [0], [0], [1], [0, 0, 1, 1], [], []>} : vector<24x128xbf16>, vector<128x32xbf16>, vector<24x32xf32> -> vector<24x32xf32>
    %c0_17 = arith.constant 0 : index
    %c0_18 = arith.constant 0 : index
    %32 = vector.load %arg6[%c0_17, %c0_18] : memref<1x32xf32, #tpu.memory_space<vmem>>, vector<1x32xf32>
    %33 = vector.broadcast %32 : vector<1x32xf32> to vector<24x32xf32>
    %34 = arith.addf %31, %33 : vector<24x32xf32>
    %35 = arith.truncf %34 : vector<24x32xf32> to vector<24x32xbf16>
    %c0_19 = arith.constant 0 : index
    %c0_20 = arith.constant 0 : index
    %36 = vector.load %arg7[%c0_19, %c0_20] : memref<24x32xbf16, #tpu.memory_space<vmem>>, vector<24x32xbf16>
    tpu.vector_store %arg7[%c0_19, %c0_20], %35 {strides = array<i32>} : memref<24x32xbf16, #tpu.memory_space<vmem>>, vector<24x32xbf16>,
    return
  }
  func.func @transform_0(%arg0: i32) -> (i32, i32, i32) {
    %c0_i32 = arith.constant 0 : i32
    %c0_i32_0 = arith.constant 0 : i32
    %c0_i32_1 = arith.constant 0 : i32
    return %arg0, %c0_i32, %c0_i32_0 : i32, i32, i32
  }
  func.func @transform_1(%arg0: i32) -> (i32, i32) {
    %c0_i32 = arith.constant 0 : i32
    %c0_i32_0 = arith.constant 0 : i32
    return %arg0, %c0_i32 : i32, i32
  }
  func.func @transform_2(%arg0: i32) -> (i32, i32, i32) {
    %c0_i32 = arith.constant 0 : i32
    %c0_i32_0 = arith.constant 0 : i32
    %c0_i32_1 = arith.constant 0 : i32
    return %arg0, %c0_i32, %c0_i32_0 : i32, i32, i32
  }
  func.func @transform_3(%arg0: i32) -> (i32, i32) {
    %c0_i32 = arith.constant 0 : i32
    %c0_i32_0 = arith.constant 0 : i32
    return %arg0, %c0_i32 : i32, i32
  }
  func.func @transform_4(%arg0: i32) -> (i32, i32) {
    %c0_i32 = arith.constant 0 : i32
    %c0_i32_0 = arith.constant 0 : i32
    %c0_i32_1 = arith.constant 0 : i32
    return %c0_i32, %c0_i32_0 : i32, i32
  }
  func.func @transform_5(%arg0: i32) -> (i32, i32) {
    %c0_i32 = arith.constant 0 : i32
    %c0_i32_0 = arith.constant 0 : i32
    %c0_i32_1 = arith.constant 0 : i32
    return %c0_i32, %c0_i32_0 : i32, i32
  }
  func.func @transform_6(%arg0: i32) -> (i32, i32) {
    %c0_i32 = arith.constant 0 : i32
    %c0_i32_0 = arith.constant 0 : i32
    return %arg0, %c0_i32 : i32, i32
  }
}

</mosaic_0001>

<bundles_post_ra>
// kernel: tpu_custom_call.1
= control target key start
LH: loop header
LB: loop body
LE: loop exit
PB: predicated region body
PF: predicated region fallthrough
CT: control target
= control target key end

     0   :  { %11 = vsyncpa [#allocation3], 0  ;;  %s2507_s0 = inlined_call_operand.vmem [shape: bf16[24,8,64], index: 0, kind: input, shape index: {}]   ;;  %s2508_s1 = inlined_call_operand.vmem [shape: s32[24,8], index: 1, kind: input, shape index: {}]   ;;  %s2509_s2 = inlined_call_operand.hbm [shape: bf16[24,8,64], index: 2, kind: input, shape index: {}]   ;;  %s2510_s3 = inlined_call_operand.vmem [shape: s32[24,8], index: 3, kind: input, shape index: {}]   ;;  %s2511_s4 = inlined_call_operand.vmem [shape: bf16[128,32], index: 4, kind: input, shape index: {}]   ;;  %s2512_s5 = inlined_call_operand.vmem [shape: f32[1,32], index: 5, kind: input, shape index: {}]   ;;  %s2513_s6 = inlined_call_operand.hbm [shape: bf16[24,32], index: 6, kind: output, shape index: {}]  }
   0x1   :  { %12 = vsyncpa [#allocation4], 0  ;;  %s1714_s21 = smov [#allocation2]  }
   0x2   :  { %s22_s22 = sshll.u32 %s1714_s21, 4  ;;  %s23_s22 = int_to_ptr.vmem [resolvable:$true] %s22_s22 }
   0x3   :  { %s1678_s23 = scalar_lea.vmem %s23_s22, 1536  ;;  %p1683_p1 = scmp.lt.s32.totalorder %s23_s22, %s23_s22 }
   0x4   :  { %p1679_p0 = scmp.ne.s32.totalorder %s23_s22, %s1678_s23  ;;  %p1684_p2 = scmp.lt.s32.totalorder %s1678_s23, %s1678_s23 }
   0x6   :  { %p1685_p3 = por %p1684_p2, %p1683_p1 }
   0x8   :  { %p1686_p4 = pnand %p1685_p3, %p1679_p0 }
   0xa   :  { %1689 = shalt.err (!%p1686_p4)
}
   0xb   :  { %s1715_s24 = smov 64   ;;  %s1716_s25 = smov 4  }
   0xc   :  { %28 = dma.hbm_to_vmem [thread:$0]  %s2509_s2, 1536, %s23_s22, [#allocation3], %s1715_s24, %s1715_s24, %s1716_s25  }
   0xd   :  { %1710 = dma.done.wait [#allocation3], 1536  }
   0xe   :  { %1711 = vsyncadd [#allocation3], 4294965760  ;;  %vm454_vm0 = vcmask 64512   ;;  %v565_v0 = vld [vmem:[%s2510_s3 + $0x10] sm:$0xff]  ;;  %v563_v1 = vld [vmem:[%s2510_s3] sm:$0xff]  ;;  %v93_v9 = vlaneseq  ;;  %vm285_vm1 = vcmask 523264  }
   0xf   :  { %v564_v2 = vld [vmem:[%s2510_s3 + $0x8] sm:$0xff]  ;;  %v1768_v3 = vcvt.s32.f32 %v565_v0  ;;  %v566_v4 = vcvt.s32.f32 %v563_v1  ;;  %v41_v45 = vld [vmem:[%s2508_s1 + $0x10] sm:$0xff]  ;;  %v39_v46 = vld [vmem:[%s2508_s1] sm:$0xff]  ;;  %vm1110_vm2 = vcmask 1041409   ;;  %vm1113_vm3 = vcmask 1042434   ;;  %s1717_s30 = smov [#allocation5]  }
  0x10   :  { %v567_v5 = vcvt.s32.f32 %v564_v2  ;;  %v94_v10 = vshrl.u32 %v93_v9, 7  ;;  %v40_v43 = vld [vmem:[%s2508_s1 + $0x8] sm:$0xff]  ;;  %v1835_v48 = vcvt.s32.f32 %v41_v45  ;;  %v1837_v49 = vcvt.s32.f32 %v39_v46  ;;  %v1861_v61 = vld [vmem:[#allocation2] sm:$0xff]   ;;  %v1924_v46 = vld [vmem:[#allocation2 + $0x38] sm:$0xff]  }
  0x11   :  { %v983_v6 = vsel %vm454_vm0, %v1768_v3, 0.0  ;;  %v977_v7 = vsel %vm454_vm0, %v566_v4, 0.0  ;;  %v1825_v44 = vcvt.s32.f32 %v40_v43  ;;  %v1863_v62 = vld [vmem:[#allocation2 + $0x20] sm:$0xff]   ;;  %v1865_v63 = vld [vmem:[#allocation2 + $0x8] sm:$0xff]   ;;  %v1460_v2 = vunpack.c.h.bf16 %v1861_v61 }
  0x12   :  { %984 = vadd.xlane.f32.xlu1 %v983_v6  ;;  %978 = vadd.xlane.f32.xlu0 %v977_v7  ;;  %v980_v8 = vsel %vm454_vm0, %v567_v5, 0.0  ;;  %v1774_v11 = vsub.s32 1, %v94_v10  ;;  %v1777_v13 = vsub.s32 2, %v94_v10  ;;  %v1782_v17 = vsub.s32 0, %v94_v10  ;;  %v1869_v1 = vld [vmem:[#allocation2 + $0x28] sm:$0xff]  }
  0x13   :  { %v1786_v19 = vsub.s32 3, %v94_v10  ;;  %v1792_v24 = vsub.s32 4, %v94_v10  ;;  %v1800_v29 = vsub.s32 5, %v94_v10  ;;  %v1806_v33 = vsub.s32 6, %v94_v10 }
  0x14   :  { %v627_v12 = vrot.slane %v566_v4, %v1774_v11  ;;  %v634_v14 = vrot.slane %v566_v4, %v1777_v13  ;;  %v690_v15 = vrot.slane %v567_v5, %v1777_v13  ;;  %v683_v16 = vrot.slane %v567_v5, %v1774_v11 }
  0x15   :  { %v739_v18 = vrot.slane %v1768_v3, %v1774_v11  ;;  %v620_v20 = vrot.slane %v566_v4, %v1782_v17  ;;  %v641_v21 = vrot.slane %v566_v4, %v1786_v19  ;;  %v676_v22 = vrot.slane %v567_v5, %v1782_v17 }
  0x16   :  { %981 = vadd.xlane.f32.xlu0 %v980_v8  ;;  %v697_v23 = vrot.slane %v567_v5, %v1786_v19  ;;  %v746_v25 = vrot.slane %v1768_v3, %v1777_v13  ;;  %v648_v26 = vrot.slane %v566_v4, %v1792_v24  ;;  %v704_v27 = vrot.slane %v567_v5, %v1792_v24  ;;  %v1880_v8 = vld [vmem:[#allocation2 + $0x48] sm:$0xff]  }
  0x17   :  { %v732_v28 = vrot.slane %v1768_v3, %v1782_v17  ;;  %v753_v30 = vrot.slane %v1768_v3, %v1786_v19  ;;  %v655_v31 = vrot.slane %v566_v4, %v1800_v29  ;;  %v711_v32 = vrot.slane %v567_v5, %v1800_v29 }
  0x18   :  { %v760_v34 = vrot.slane %v1768_v3, %v1792_v24  ;;  %v662_v35 = vrot.slane %v566_v4, %v1806_v33  ;;  %v718_v36 = vrot.slane %v567_v5, %v1806_v33  ;;  %v1812_v37 = vsub.s32 7, %v94_v10 }
  0x19   :  { %v767_v38 = vrot.slane %v1768_v3, %v1800_v29  ;;  %v774_v41 = vrot.slane %v1768_v3, %v1806_v33  ;;  %v458_v47 = vsel %vm454_vm0, %v1825_v44, 0.0  ;;  %v461_v50 = vsel %vm454_vm0, %v1835_v48, 0.0 }
  0x1a   :  { %v669_v39 = vrot.slane %v566_v4, %v1812_v37  ;;  %v725_v40 = vrot.slane %v567_v5, %v1812_v37  ;;  %v781_v42 = vrot.slane %v1768_v3, %v1812_v37  ;;  %v455_v51 = vsel %vm454_vm0, %v1837_v49, 0.0  ;;  %v1874_v4 = vld [vmem:[#allocation2 + $0x40] sm:$0xff]  }
  0x1b   :  { %v159_v52 = vrot.slane %v1825_v44, %v1774_v11  ;;  %v110_v53 = vrot.slane %v1837_v49, %v1777_v13  ;;  %v103_v54 = vrot.slane %v1837_v49, %v1774_v11  ;;  %v166_v55 = vrot.slane %v1825_v44, %v1777_v13 }
  0x1c   :  { %v215_v56 = vrot.slane %v1835_v48, %v1774_v11  ;;  %v96_v57 = vrot.slane %v1837_v49, %v1782_v17  ;;  %v117_v58 = vrot.slane %v1837_v49, %v1786_v19  ;;  %v152_v59 = vrot.slane %v1825_v44, %v1782_v17 }
  0x1d   :  { %v173_v60 = vrot.slane %v1825_v44, %v1786_v19  ;;  %v222_v0 = vrot.slane %v1835_v48, %v1777_v13  ;;  %v124_v3 = vrot.slane %v1837_v49, %v1792_v24  ;;  %v1476_v5 = vunpack.c.h.bf16 %v1863_v62 }
  0x1e   :  { %v1463_v6 = vunpack.c.l.bf16 %v1865_v63  ;;  %v208_v7 = vrot.slane %v1835_v48, %v1782_v17  ;;  %v1479_v11 = vunpack.c.l.bf16 %v1869_v1  ;;  %v131_v13 = vrot.slane %v1837_v49, %v1800_v29 }
  0x1f   :  { %v1475_v17 = vunpack.c.l.bf16 %v1863_v62  ;;  %v1491_v43 = vunpack.c.l.bf16 %v1874_v4  ;;  %vm1116_vm4 = vcmask 1043459   ;;  %vm1119_vm5 = vcmask 1044484  }
  0x20   :  { %vm1122_vm6 = vcmask 1045509   ;;  %vm1125_vm7 = vcmask 1046534   ;;  %vm1128_vm8 = vcmask 1047559   ;;  %vm1373_vm9 = vcmask 257024  }
  0x23   :  { %629 = vbcast.lane.b32.xlu1 %v627_v12, 256  ;;  %v1459_v12 = vunpack.c.l.bf16 %v1861_v61 }
  0x27   :  { %636 = vbcast.lane.b32.xlu1 %v634_v14, 256  ;;  %v180_v14 = vrot.slane %v1825_v44, %v1792_v24 }
  0x2b   :  { %692 = vbcast.lane.b32.xlu1 %v690_v15, 256  ;;  %v1888_v15 = vld [vmem:[#allocation2 + $0x30] sm:$0xff]  }
  0x2c   :  { %685 = vbcast.lane.b32.xlu0 %v683_v16, 256  ;;  %v1492_v16 = vunpack.c.h.bf16 %v1874_v4  ;;  %v1484_v45 = vunpack.c.h.bf16 %v1888_v15 }
  0x2f   :  { %741 = vbcast.lane.b32.xlu1 %v739_v18, 256  ;;  %v236_v18 = vrot.slane %v1835_v48, %v1792_v24 }
  0x30   :  { %622 = vbcast.lane.b32.xlu0 %v620_v20, 256  ;;  %v229_v20 = vrot.slane %v1835_v48, %v1786_v19  ;;  %v145_v19 = vrot.slane %v1837_v49, %v1812_v37 }
  0x33   :  { %643 = vbcast.lane.b32.xlu1 %v641_v21, 256  ;;  %v1896_v21 = vld [vmem:[#allocation2 + $0x10] sm:$0xff]  }
  0x34   :  { %678 = vbcast.lane.b32.xlu0 %v676_v22, 256  ;;  %v1464_v22 = vunpack.c.h.bf16 %v1865_v63 }
  0x37   :  { %699 = vbcast.lane.b32.xlu1 %v697_v23, 256  ;;  %v1495_v23 = vunpack.c.l.bf16 %v1880_v8 }
  0x38   :  { %748 = vbcast.lane.b32.xlu0 %v746_v25, 256  ;;  %v194_v25 = vrot.slane %v1825_v44, %v1806_v33 }
  0x3b   :  { %650 = vbcast.lane.b32.xlu1 %v648_v26, 256  ;;  %v187_v26 = vrot.slane %v1825_v44, %v1800_v29 }
  0x3c   :  { %706 = vbcast.lane.b32.xlu0 %v704_v27, 256  ;;  %v1480_v27 = vunpack.c.h.bf16 %v1869_v1 }
  0x3f   :  { %734 = vbcast.lane.b32.xlu1 %v732_v28, 256  ;;  %v1483_v28 = vunpack.c.l.bf16 %v1888_v15 }
  0x40   :  { %755 = vbcast.lane.b32.xlu0 %v753_v30, 256  ;;  %v138_v30 = vrot.slane %v1837_v49, %v1806_v33 }
  0x43   :  { %657 = vbcast.lane.b32.xlu1 %v655_v31, 256  ;;  %v1910_v31 = vld [vmem:[#allocation2 + $0x18] sm:$0xff]  }
  0x44   :  { %713 = vbcast.lane.b32.xlu0 %v711_v32, 256 }
  0x47   :  { %762 = vbcast.lane.b32.xlu1 %v760_v34, 256 }
  0x48   :  { %664 = vbcast.lane.b32.xlu0 %v662_v35, 256  ;;  %v1467_v35 = vunpack.c.l.bf16 %v1896_v21 }
  0x4b   :  { %720 = vbcast.lane.b32.xlu1 %v718_v36, 256  ;;  %v1496_v36 = vunpack.c.h.bf16 %v1880_v8 }
  0x4c   :  { %769 = vbcast.lane.b32.xlu0 %v767_v38, 256  ;;  %v250_v38 = vrot.slane %v1835_v48, %v1806_v33 }
  0x4f   :  { %671 = vbcast.lane.b32.xlu1 %v669_v39, 256  ;;  %v243_v39 = vrot.slane %v1835_v48, %v1800_v29 }
  0x50   :  { %727 = vbcast.lane.b32.xlu0 %v725_v40, 256  ;;  %v1918_v40 = vld [vmem:[#allocation2 + $0x50] sm:$0xff]  }
  0x53   :  { %776 = vbcast.lane.b32.xlu1 %v774_v41, 256 }
  0x54   :  { %783 = vbcast.lane.b32.xlu0 %v781_v42, 256 }
  0x73   :  { %459 = vadd.xlane.f32.xlu0 %v458_v47  ;;  %v1926_v47 = vld [vmem:[#allocation2 + $0x58] sm:$0xff]  }
  0x77   :  { %462 = vadd.xlane.f32.xlu0 %v461_v50  ;;  %456 = vadd.xlane.f32.xlu1 %v455_v51  ;;  %v201_v50 = vrot.slane %v1825_v44, %v1812_v37 }
  0x88   :  { %161 = vbcast.lane.b32.xlu1 %v159_v52, 256 }
  0x8c   :  { %112 = vbcast.lane.b32.xlu1 %v110_v53, 256  ;;  %v257_v53 = vrot.slane %v1835_v48, %v1812_v37 }
  0x8d   :  { %105 = vbcast.lane.b32.xlu0 %v103_v54, 256 }
  0x90   :  { %168 = vbcast.lane.b32.xlu1 %v166_v55, 256 }
  0x91   :  { %217 = vbcast.lane.b32.xlu0 %v215_v56, 256 }
  0x94   :  { %98 = vbcast.lane.b32.xlu1 %v96_v57, 256 }
  0x95   :  { %119 = vbcast.lane.b32.xlu0 %v117_v58, 256 }
  0x98   :  { %154 = vbcast.lane.b32.xlu1 %v152_v59, 256 }
  0x99   :  { %175 = vbcast.lane.b32.xlu0 %v173_v60, 256 }
  0x9b   :  { %v985_v9 = vpop.xlane.xlu1 %984  ;;  %v979_v10 = vpop.xlane.xlu0 %978 }
  0x9c   :  { %224 = vbcast.lane.b32.xlu1 %v222_v0, 256  ;;  %v1920_v41 = vmax.f32 %v979_v10, 1.0  ;;  %v1934_v54 = vmax.f32 %v985_v9, 1.0 }
  0x9d   :  { %126 = vbcast.lane.b32.xlu0 %v124_v3, 256 }
  0x9e   :  { %v993_v57 = vrot.slane %v1920_v41, 2  ;;  %1574 = vrcp.f32 %v1920_v41  ;;  %v994_v3 = vrot.slane %v1920_v41, 3  ;;  %v996_v60 = vrot.slane %v1920_v41, 5 }
  0x9f   :  { %v982_v32 = vpop.xlane.xlu0 %981  ;;  %v630_v34 = vpop.permute.xlu1 %629 }
  0xa0   :  { %v786_v42 = vmul.f32 %v1460_v2, %v630_v34  ;;  %182 = vbcast.lane.b32.xlu1 %v180_v14, 256  ;;  %v1945_v34 = vmax.f32 %v982_v32, 1.0  ;;  %v1006_v2 = vrot.slane %v1934_v54, 1  ;;  %v1008_v14 = vrot.slane %v1934_v54, 3 }
  0xa1   :  { %210 = vbcast.lane.b32.xlu0 %v208_v7, 256  ;;  %v992_v7 = vrot.slane %v1920_v41, 1 }
  0xa2   :  { %v816_v55 = vsel %vm285_vm1, %v786_v42, 0.0  ;;  %v999_v52 = vrot.slane %v1945_v34, 1 }
  0xa3   :  { %v686_v58 = vpop.permute.xlu0 %685  ;;  %v637_v59 = vpop.permute.xlu1 %636  ;;  %v817_v42 = vrot.slane %v816_v55, 4  ;;  %1576 = vrcp.f32 %v992_v7 }
  0xa4   :  { %v794_v9 = vmul.f32 %v1476_v5, %v686_v58  ;;  %v787_v10 = vmul.f32 %v1463_v6, %v637_v59  ;;  %231 = vbcast.lane.b32.xlu1 %v229_v20, 256  ;;  %v1007_v5 = vrot.slane %v1934_v54, 2  ;;  %v995_v59 = vrot.slane %v1920_v41, 4 }
  0xa5   :  { %133 = vbcast.lane.b32.xlu0 %v131_v13, 256  ;;  %v818_v56 = vadd.f32 %v817_v42, %v816_v55  ;;  %1578 = vrcp.f32 %v993_v57 }
  0xa6   :  { %v872_v0 = vsel %vm285_vm1, %v794_v9, 0.0  ;;  %v823_v20 = vsel %vm285_vm1, %v787_v10, 0.0  ;;  %v997_v10 = vrot.slane %v1920_v41, 6  ;;  %1580 = vrcp.f32 %v1006_v2 }
  0xa7   :  { %v873_v6 = vrot.slane %v872_v0, 4  ;;  %v693_v58 = vpop.permute.xlu1 %692  ;;  %v623_v32 = vpop.permute.xlu0 %622  ;;  %v824_v51 = vrot.slane %v823_v20, 4  ;;  %1582 = vrcp.f32 %v1945_v34  ;;  %v1001_v2 = vrot.slane %v1945_v34, 3 }
  0xa8   :  { %v795_v13 = vmul.f32 %v1479_v11, %v693_v58  ;;  %v785_v9 = vmul.f32 %v1459_v12, %v623_v32  ;;  %189 = vbcast.lane.b32.xlu1 %v187_v26, 256  ;;  %v1000_v12 = vrot.slane %v1945_v34, 2  ;;  %1584 = vrcp.f32 %v999_v52 }
  0xa9   :  { %238 = vbcast.lane.b32.xlu0 %v236_v18, 256  ;;  %v874_v7 = vadd.f32 %v873_v6, %v872_v0  ;;  %v819_v0 = vrot.slane %v818_v56, 2  ;;  %v825_v32 = vadd.f32 %v824_v51, %v823_v20  ;;  %v1002_v52 = vrot.slane %v1945_v34, 4 }
  0xaa   :  { %v879_v11 = vsel %vm285_vm1, %v795_v13, 0.0  ;;  %v809_v61 = vsel %vm285_vm1, %v785_v9, 0.0  ;;  %1586 = vrcp.f32 %v1000_v12  ;;  %v1004_v20 = vrot.slane %v1945_v34, 6 }
  0xab   :  { %v880_v26 = vrot.slane %v879_v11, 4  ;;  %v742_v55 = vpop.permute.xlu1 %741  ;;  %v679_v42 = vpop.permute.xlu0 %678  ;;  %v810_v58 = vrot.slane %v809_v61, 4  ;;  %v820_v51 = vadd.f32 %v819_v0, %v818_v56  ;;  %1588 = vrcp.f32 %v994_v3 }
  0xac   :  { %v802_v24 = vmul.f32 %v1492_v16, %v742_v55  ;;  %v793_v18 = vmul.f32 %v1475_v17, %v679_v42  ;;  %140 = vbcast.lane.b32.xlu1 %v138_v30, 256  ;;  %v875_v16 = vrot.slane %v874_v7, 2  ;;  %v1003_v55 = vrot.slane %v1945_v34, 5 }
  0xad   :  { %196 = vbcast.lane.b32.xlu0 %v194_v25, 256  ;;  %v881_v17 = vadd.f32 %v880_v26, %v879_v11  ;;  %v811_v42 = vadd.f32 %v810_v58, %v809_v61  ;;  %v998_v11 = vrot.slane %v1920_v41, 7  ;;  %v1997_v61 = vpop.eup %1574  ;;  %v826_v26 = vrot.slane %v825_v32, 2  ;;  %v1571_v41 = vld [vmem:[%s2511_s4 + $0x10] sm:$0xff]  }
  0xae   :  { %v928_v13 = vsel %vm285_vm1, %v802_v24, 0.0  ;;  %v865_v62 = vsel %vm285_vm1, %v793_v18, 0.0  ;;  %v876_v12 = vadd.f32 %v875_v16, %v874_v7  ;;  %1590 = vrcp.f32 %v1007_v5 }
  0xaf   :  { %v644_v9 = vpop.permute.xlu1 %643  ;;  %v749_v30 = vpop.permute.xlu0 %748  ;;  %v929_v25 = vrot.slane %v928_v13, 4  ;;  %v866_v57 = vrot.slane %v865_v62, 4  ;;  %v882_v58 = vrot.slane %v881_v17, 2  ;;  %1592 = vrcp.f32 %v1001_v2 }
  0xb0   :  { %v788_v6 = vmul.f32 %v1464_v22, %v644_v9  ;;  %245 = vbcast.lane.b32.xlu1 %v243_v39, 256  ;;  %v803_v24 = vmul.f32 %v1495_v23, %v749_v30  ;;  %v1577_v7 = vpop.eup %1576  ;;  %1594 = vrcp.f32 %v1002_v52  ;;  %v1005_v5 = vrot.slane %v1945_v34, 7 }
  0xb1   :  { %147 = vbcast.lane.b32.xlu0 %v145_v19, 256  ;;  %v930_v63 = vadd.f32 %v929_v25, %v928_v13  ;;  %v867_v29 = vadd.f32 %v866_v57, %v865_v62  ;;  %v812_v19 = vrot.slane %v811_v42, 2  ;;  %v1011_v57 = vrot.slane %v1934_v54, 6 }
  0xb2   :  { %v830_v22 = vsel %vm285_vm1, %v788_v6, 0.0  ;;  %v2012_v0 = vpop.eup %1578  ;;  %v821_v6 = vrot.slane %v820_v51, 1  ;;  %v877_v23 = vrot.slane %v876_v12, 1  ;;  %v827_v2 = vadd.f32 %v826_v26, %v825_v32 }
  0xb3   :  { %v831_v39 = vrot.slane %v830_v22, 4  ;;  %v700_v56 = vpop.permute.xlu1 %699  ;;  %v707_v49 = vpop.permute.xlu0 %706  ;;  %v931_v3 = vrot.slane %v930_v63, 2  ;;  %v935_v16 = vsel %vm285_vm1, %v803_v24, 0.0  ;;  %v883_v44 = vadd.f32 %v882_v58, %v881_v17 }
  0xb4   :  { %203 = vbcast.lane.b32.xlu1 %v201_v50, 256  ;;  %v868_v50 = vrot.slane %v867_v29, 2  ;;  %v936_v13 = vrot.slane %v935_v16, 4  ;;  %v796_v62 = vmul.f32 %v1480_v27, %v700_v56  ;;  %v813_v30 = vadd.f32 %v812_v19, %v811_v42 }
  0xb5   :  { %v832_v18 = vadd.f32 %v831_v39, %v830_v22  ;;  %252 = vbcast.lane.b32.xlu0 %v250_v38, 256  ;;  %v2017_v38 = vpop.eup %1580  ;;  %v932_v52 = vadd.f32 %v931_v3, %v930_v63  ;;  %v797_v25 = vmul.f32 %v1483_v28, %v707_v49  ;;  %1596 = vrcp.f32 %v995_v59 }
  0xb6   :  { %v2026_v32 = vpop.eup %1582  ;;  %v937_v27 = vadd.f32 %v936_v13, %v935_v16  ;;  %v886_v17 = vsel %vm285_vm1, %v796_v62, 0.0  ;;  %v822_v63 = vadd.f32 %v821_v6, %v820_v51  ;;  %v878_v22 = vadd.f32 %v877_v23, %v876_v12 }
  0xb7   :  { %v651_v9 = vpop.permute.xlu1 %650  ;;  %v756_v33 = vpop.permute.xlu0 %755  ;;  %v833_v1 = vrot.slane %v832_v18, 2  ;;  %v828_v58 = vrot.slane %v827_v2, 1  ;;  %v887_v28 = vrot.slane %v886_v17, 4  ;;  %v884_v39 = vrot.slane %v883_v44, 1 }
  0xb8   :  { %259 = vbcast.lane.b32.xlu1 %v257_v53, 256  ;;  %v1585_v42 = vpop.eup %1584  ;;  %v869_v56 = vadd.f32 %v868_v50, %v867_v29  ;;  %v893_v59 = vsel %vm285_vm1, %v797_v25, 0.0  ;;  %v789_v37 = vmul.f32 %v1467_v35, %v651_v9  ;;  %v814_v19 = vrot.slane %v813_v30, 1 }
  0xb9   :  { %v1587_v49 = vpop.eup %1586  ;;  %v933_v3 = vrot.slane %v932_v52, 1  ;;  %v888_v24 = vadd.f32 %v887_v28, %v886_v17  ;;  %v894_v16 = vrot.slane %v893_v59, 4  ;;  %v834_v13 = vadd.f32 %v833_v1, %v832_v18 }
  0xba   :  { %v938_v51 = vrot.slane %v937_v27, 2  ;;  %v837_v12 = vsel %vm285_vm1, %v789_v37, 0.0  ;;  %v804_v29 = vmul.f32 %v1496_v36, %v756_v33  ;;  %v1589_v6 = vpop.eup %1588  ;;  %v1040_v23 = vmul.f32 %v1577_v7, %v822_v63 }
  0xbb   :  { %v735_v48 = vpop.permute.xlu1 %734  ;;  %v714_v53 = vpop.permute.xlu0 %713  ;;  %v829_v50 = vadd.f32 %v828_v58, %v827_v2  ;;  %v889_v62 = vrot.slane %v888_v24, 2  ;;  %v895_v35 = vadd.f32 %v894_v16, %v893_v59  ;;  %v1056_v9 = vmul.f32 %v1585_v42, %v878_v22 }
  0xbc   :  { %v870_v25 = vrot.slane %v869_v56, 1  ;;  %v838_v26 = vrot.slane %v837_v12, 4  ;;  %1598 = vrcp.f32 %v1008_v14  ;;  %v2038_v28 = vpop.eup %1590  ;;  %v885_v18 = vadd.f32 %v884_v39, %v883_v44 }
  0xbd   :  { %v815_v1 = vadd.f32 %v814_v19, %v813_v30  ;;  %v934_v37 = vadd.f32 %v933_v3, %v932_v52  ;;  %v942_v8 = vsel %vm285_vm1, %v804_v29, 0.0  ;;  %v2041_v36 = vpop.eup %1592  ;;  %v835_v7 = vrot.slane %v834_v13, 1 }
  0xbe   :  { %v939_v2 = vadd.f32 %v938_v51, %v937_v27  ;;  %1600 = vrcp.f32 %v1934_v54  ;;  %v801_v33 = vmul.f32 %v1491_v43, %v735_v48  ;;  %v2046_v63 = vpop.eup %1594  ;;  %v1185_v14 = vrot.slane %v1040_v23, 7 }
  0xbf   :  { %v658_v17 = vpop.permute.xlu1 %657  ;;  %v665_v42 = vpop.permute.xlu0 %664  ;;  %v2049_v22 = vmul.f32 %v2012_v0, %v829_v50  ;;  %v890_v44 = vadd.f32 %v889_v62, %v888_v24  ;;  %v896_v30 = vrot.slane %v895_v35, 2  ;;  %v871_v52 = vadd.f32 %v870_v25, %v869_v56 }
  0xc0   :  { %v839_v58 = vadd.f32 %v838_v26, %v837_v12  ;;  %v943_v39 = vrot.slane %v942_v8, 4  ;;  %v798_v27 = vmul.f32 %v1484_v45, %v714_v53  ;;  %v1199_v19 = vrot.slane %v1056_v9, 7 }
  0xc1   :  { %v2053_v3 = vmul.f32 %v1587_v49, %v885_v18  ;;  %v1038_v4 = vmul.f32 %v1997_v61, %v815_v1  ;;  %v2057_v43 = vmul.f32 %v2017_v38, %v934_v37  ;;  %v836_v0 = vadd.f32 %v835_v7, %v834_v13 }
  0xc2   :  { %v2059_v48 = vpop.eup %1596  ;;  %v940_v24 = vrot.slane %v939_v2, 1  ;;  %v921_v56 = vsel %vm285_vm1, %v801_v33, 0.0  ;;  %v900_v26 = vsel %vm285_vm1, %v798_v27, 0.0  ;;  %v1187_v15 = vrot.slane %v2049_v22, 6 }
  0xc3   :  { %v763_v59 = vpop.permute.xlu1 %762  ;;  %v891_v45 = vrot.slane %v890_v44, 1  ;;  %v897_v53 = vadd.f32 %v896_v30, %v895_v35  ;;  %v901_v16 = vrot.slane %v900_v26, 4  ;;  %v1054_v49 = vmul.f32 %v2026_v32, %v871_v52  ;;  %v770_v29 = vpop.permute.xlu0 %769 }
  0xc4   :  { %v840_v51 = vrot.slane %v839_v58, 2  ;;  %v944_v61 = vadd.f32 %v943_v39, %v942_v8  ;;  %v2514_v38 = vunpack.c.h.bf16 %v1896_v21  ;;  %v1201_v13 = vrot.slane %v2053_v3, 6 }
  0xc5   :  { %v2069_v23 = vsel %vm1110_vm2, %v1185_v14, %v1038_v4  ;;  %v1213_v50 = vrot.slane %v2057_v43, 7  ;;  %v922_v62 = vrot.slane %v921_v56, 4  ;;  %v2072_v25 = vmul.f32 %v1589_v6, %v836_v0 }
  0xc6   :  { %v790_v12 = vmul.f32 %v2514_v38, %v658_v17  ;;  %v941_v35 = vadd.f32 %v940_v24, %v939_v2  ;;  %v2515_v18 = vunpack.c.l.bf16 %v1910_v31  ;;  %v892_v21 = vadd.f32 %v891_v45, %v890_v44  ;;  %v1566_v44 = vld [vmem:[%s2511_s4 + $0x38] sm:$0xff]  }
  0xc7   :  { %v721_v9 = vpop.permute.xlu1 %720  ;;  %v898_v17 = vrot.slane %v897_v53, 1  ;;  %v902_v37 = vadd.f32 %v901_v16, %v900_v26  ;;  %v2078_v7 = vsel %vm1110_vm2, %v1199_v19, %v1054_v49  ;;  %v2080_v33 = vadd.f32 %v840_v51, %v839_v58  ;;  %v1567_v58 = vld [vmem:[%s2511_s4 + $0x30] sm:$0xff]   ;;  %v728_v4 = vpop.permute.xlu0 %727  ;;  %1537 = vmatprep.subr.bf16.mxu0 %v1566_v44 }
  0xc8   :  { %v844_v32 = vsel %vm285_vm1, %v790_v12, 0.0  ;;  %v791_v1 = vmul.f32 %v2515_v18, %v665_v42  ;;  %v945_v14 = vrot.slane %v944_v61, 2  ;;  %v923_v2 = vadd.f32 %v922_v62, %v921_v56  ;;  %1538 = vmatpush3.bf16.msra.mxu0 %v1566_v44 }
  0xc9   :  { %v845_v8 = vrot.slane %v844_v32, 4  ;;  %v2083_v6 = vpop.eup %1598  ;;  %1602 = vrcp.f32 %v1003_v55  ;;  %v1189_v39 = vrot.slane %v2072_v25, 5  ;;  %v2095_v27 = vmul.f32 %v2038_v28, %v941_v35  ;;  %1539 = vmatprep.subr.bf16.mxu0 %v1567_v58 }
  0xca   :  { %v851_v30 = vsel %vm285_vm1, %v791_v1, 0.0  ;;  %1604 = vrcp.f32 %v996_v60  ;;  %v2516_v55 = vunpack.c.l.bf16 %v1918_v40  ;;  %v2104_v24 = vmul.f32 %v2041_v36, %v892_v21 }
  0xcb   :  { %v846_v52 = vadd.f32 %v845_v8, %v844_v32  ;;  %v852_v42 = vrot.slane %v851_v30, 4  ;;  %v2101_v0 = vpop.eup %1600  ;;  %v899_v56 = vadd.f32 %v898_v17, %v897_v53  ;;  %v903_v26 = vrot.slane %v902_v37, 2  ;;  %v672_v16 = vpop.permute.xlu1 %671  ;;  %v1568_v53 = vld [vmem:[%s2511_s4 + $0x28] sm:$0xff]  }
  0xcc   :  { %v805_v19 = vmul.f32 %v2516_v55, %v763_v59  ;;  %v842_v28 = vrot.slane %v2080_v33, 1  ;;  %v2107_v49 = vadd.f32 %v945_v14, %v944_v61  ;;  %v2517_v51 = vunpack.c.h.bf16 %v1918_v40  ;;  %v784_v44 = vpop.permute.xlu0 %783  ;;  %1540 = vmatpush3.bf16.msra.mxu0 %v1567_v58 }
  0xcd   :  { %v853_v45 = vadd.f32 %v852_v42, %v851_v30  ;;  %v924_v38 = vrot.slane %v923_v2, 2  ;;  %v847_v12 = vrot.slane %v846_v52, 2  ;;  %1606 = vrcp.f32 %v997_v10  ;;  %1541 = vmatprep.subr.bf16.mxu0 %v1568_v53 }
  0xce   :  { %v949_v60 = vsel %vm285_vm1, %v805_v19, 0.0  ;;  %v806_v59 = vmul.f32 %v2517_v51, %v770_v29  ;;  %v2518_v62 = vunpack.c.l.bf16 %v1924_v46  ;;  %v2519_v40 = vunpack.c.h.bf16 %v1924_v46 }
  0xcf   :  { %v950_v36 = vrot.slane %v949_v60, 4  ;;  %v2520_v32 = vunpack.c.h.bf16 %v1910_v31  ;;  %v1203_v1 = vrot.slane %v2104_v24, 5  ;;  %v904_v10 = vadd.f32 %v903_v26, %v902_v37  ;;  %v1569_v31 = vld [vmem:[%s2511_s4 + $0x20] sm:$0xff]  }
  0xd0   :  { %v956_v61 = vsel %vm285_vm1, %v806_v59, 0.0  ;;  %v799_v35 = vmul.f32 %v2518_v62, %v721_v9  ;;  %v800_v29 = vmul.f32 %v2519_v40, %v728_v4  ;;  %v854_v21 = vrot.slane %v853_v45, 2  ;;  %1542 = vmatpush3.bf16.msra.mxu0 %v1568_v53 }
  0xd1   :  { %v792_v18 = vmul.f32 %v2520_v32, %v672_v16  ;;  %v951_v17 = vadd.f32 %v950_v36, %v949_v60  ;;  %v957_v8 = vrot.slane %v956_v61, 4  ;;  %v925_v9 = vadd.f32 %v924_v38, %v923_v2  ;;  %1543 = vmatprep.subr.bf16.mxu0 %v1569_v31 }
  0xd2   :  { %v907_v14 = vsel %vm285_vm1, %v799_v35, 0.0  ;;  %v914_v30 = vsel %vm285_vm1, %v800_v29, 0.0  ;;  %v848_v46 = vadd.f32 %v847_v12, %v846_v52  ;;  %1608 = vrcp.f32 %v1004_v20  ;;  %v777_v12 = vpop.permute.xlu1 %776 }
  0xd3   :  { %v858_v42 = vsel %vm285_vm1, %v792_v18, 0.0  ;;  %v952_v55 = vrot.slane %v951_v17, 2  ;;  %v958_v37 = vadd.f32 %v957_v8, %v956_v61  ;;  %v908_v19 = vrot.slane %v907_v14, 4 }
  0xd4   :  { %v915_v4 = vrot.slane %v914_v30, 4  ;;  %v859_v26 = vrot.slane %v858_v42, 4  ;;  %v2134_v16 = vmul.f32 %v2046_v63, %v899_v56  ;;  %v905_v60 = vrot.slane %v904_v10, 1  ;;  %v1570_v56 = vld [vmem:[%s2511_s4 + $0x18] sm:$0xff]   ;;  %1544 = vmatpush3.bf16.msra.mxu0 %v1569_v31 }
  0xd5   :  { %v2521_v2 = vrot.slane %v1934_v54, 4  ;;  %v2522_v52 = vunpack.c.h.bf16 %v1926_v47  ;;  %v855_v20 = vadd.f32 %v854_v21, %v853_v45  ;;  %v909_v51 = vadd.f32 %v908_v19, %v907_v14  ;;  %1545 = vmatprep.subr.bf16.mxu0 %v1570_v56 }
  0xd6   :  { %v916_v59 = vadd.f32 %v915_v4, %v914_v30  ;;  %v860_v38 = vadd.f32 %v859_v26, %v858_v42  ;;  %v843_v36 = vadd.f32 %v842_v28, %v2080_v33  ;;  %v926_v61 = vrot.slane %v925_v9, 1  ;;  %v1603_v35 = vpop.eup %1602 }
  0xd7   :  { %1610 = vrcp.f32 %v2521_v2  ;;  %v808_v58 = vmul.f32 %v2522_v52, %v784_v44  ;;  %v849_v62 = vrot.slane %v848_v46, 1  ;;  %v953_v40 = vadd.f32 %v952_v55, %v951_v17  ;;  %v1605_v18 = vpop.eup %1604 }
  0xd8   :  { %v959_v29 = vrot.slane %v958_v37, 2  ;;  %v910_v45 = vrot.slane %v909_v51, 2  ;;  %v861_v32 = vrot.slane %v860_v38, 2  ;;  %v917_v21 = vrot.slane %v916_v59, 2  ;;  %1546 = vmatpush3.bf16.msra.mxu0 %v1570_v56 }
  0xd9   :  { %v970_v63 = vsel %vm285_vm1, %v808_v58, 0.0  ;;  %v2523_v53 = vunpack.c.l.bf16 %v1926_v47  ;;  %1612 = vrcp.f32 %v998_v11  ;;  %v906_v28 = vadd.f32 %v905_v60, %v904_v10  ;;  %1547 = vmatprep.subr.bf16.mxu0 %v1571_v41 }
  0xda   :  { %v971_v8 = vrot.slane %v970_v63, 4  ;;  %v856_v14 = vrot.slane %v855_v20, 1  ;;  %v2524_v30 = vrot.slane %v1934_v54, 5  ;;  %v911_v42 = vadd.f32 %v910_v45, %v909_v51  ;;  %v1607_v47 = vpop.eup %1606 }
  0xdb   :  { %v807_v33 = vmul.f32 %v2523_v53, %v777_v12  ;;  %v850_v17 = vadd.f32 %v849_v62, %v848_v46  ;;  %v862_v44 = vadd.f32 %v861_v32, %v860_v38  ;;  %v947_v11 = vrot.slane %v2107_v49, 1 }
  0xdc   :  { %1614 = vrcp.f32 %v2524_v30  ;;  %v954_v10 = vrot.slane %v953_v40, 1  ;;  %v912_v19 = vrot.slane %v911_v42, 1  ;;  %v972_v4 = vadd.f32 %v971_v8, %v970_v63  ;;  %1548 = vmatpush3.bf16.msra.mxu0 %v1571_v41 }
  0xdd   :  { %v963_v55 = vsel %vm285_vm1, %v807_v33, 0.0  ;;  %1616 = vrcp.f32 %v1005_v5  ;;  %v1046_v31 = vmul.f32 %v2059_v48, %v843_v36  ;;  %v960_v46 = vadd.f32 %v959_v29, %v958_v37  ;;  %v1572_v48 = vld [vmem:[%s2511_s4 + $0x8] sm:$0xff]  }
  0xde   :  { %v918_v26 = vadd.f32 %v917_v21, %v916_v59  ;;  %v964_v60 = vrot.slane %v963_v55, 4  ;;  %v1205_v34 = vrot.slane %v2134_v16, 4  ;;  %v927_v5 = vadd.f32 %v926_v61, %v925_v9  ;;  %1549 = vmatprep.subr.bf16.mxu0 %v1572_v48 }
  0xdf   :  { %v857_v2 = vadd.f32 %v856_v14, %v855_v20  ;;  %v913_v52 = vadd.f32 %v912_v19, %v911_v42  ;;  %v1064_v58 = vmul.f32 %v1603_v35, %v906_v28  ;;  %v1048_v51 = vmul.f32 %v1605_v18, %v850_v17  ;;  %v1609_v37 = vpop.eup %1608 }
  0xe0   :  { %v863_v38 = vrot.slane %v862_v44, 1  ;;  %v965_v12 = vadd.f32 %v964_v60, %v963_v55  ;;  %v948_v59 = vadd.f32 %v947_v11, %v2107_v49  ;;  %v955_v36 = vadd.f32 %v954_v10, %v953_v40  ;;  %1550 = vmatpush3.bf16.msra.mxu0 %v1572_v48 }
  0xe1   :  { %v973_v16 = vrot.slane %v972_v4, 2  ;;  %1618 = vrcp.f32 %v1011_v57  ;;  %v1191_v9 = vrot.slane %v1046_v31, 4  ;;  %v961_v20 = vrot.slane %v960_v46, 1  ;;  %v1573_v57 = vld [vmem:[%s2511_s4] sm:$0xff]   ;;  %s1382_s4 = sshll.u32 %s1717_s30, 4  ;;  %s1383_s4 = int_to_ptr.vmem [resolvable:$true] %s1382_s4 }
  0xe2   :  { %v919_v61 = vrot.slane %v918_v26, 1  ;;  %v966_v62 = vrot.slane %v965_v12, 2  ;;  %v1070_v56 = vmul.f32 %v2101_v0, %v927_v5  ;;  %v1050_v35 = vmul.f32 %v1607_v47, %v857_v2  ;;  %1551 = vmatprep.subr.bf16.mxu0 %v1573_v57  ;;  %s1690_s7 = scalar_lea.vmem %s1383_s4, 192  ;;  %p1695_p6 = scmp.lt.s32.totalorder %s1383_s4, %s1383_s4 }
  0xe3   :  { %v1066_v29 = vmul.f32 %v1609_v37, %v913_v52  ;;  %v2525_v45 = vrot.slane %v1934_v54, 7  ;;  %v1207_v49 = vrot.slane %v1064_v58, 3  ;;  %v1193_v40 = vrot.slane %v1048_v51, 3  ;;  %p1691_p5 = scmp.ne.s32.totalorder %s1383_s4, %s1690_s7  ;;  %p1696_p7 = scmp.lt.s32.totalorder %s1690_s7, %s1690_s7 }
  0xe4   :  { %v1611_v63 = vpop.eup %1610  ;;  %v864_v32 = vadd.f32 %v863_v38, %v862_v44  ;;  %v967_v18 = vadd.f32 %v966_v62, %v965_v12  ;;  %v974_v8 = vadd.f32 %v973_v16, %v972_v4  ;;  %v1188_v0 = vsel %vm1113_vm3, %v1187_v15, %v2069_v23  ;;  %1552 = vmatpush3.bf16.msra.mxu0 %v1573_v57 }
  0xe5   :  { %1620 = vrcp.f32 %v2525_v45  ;;  %v1078_v21 = vmul.f32 %v1611_v63, %v955_v36  ;;  %v1202_v54 = vsel %vm1113_vm3, %v1201_v13, %v2078_v7  ;;  %v962_v53 = vadd.f32 %v961_v20, %v960_v46  ;;  %p1697_p8 = por %p1696_p7, %p1695_p6 }
  0xe6   :  { %v920_v33 = vadd.f32 %v919_v61, %v918_v26  ;;  %v1190_v28 = vsel %vm1116_vm4, %v1189_v39, %v1188_v0  ;;  %v1204_v14 = vsel %vm1116_vm4, %v1203_v1, %v1202_v54  ;;  %v1613_v30 = vpop.eup %1612  ;;  %v968_v42 = vrot.slane %v967_v18, 1 }
  0xe7   :  { %v1192_v22 = vsel %vm1119_vm5, %v1191_v9, %v1190_v28  ;;  %v1195_v15 = vrot.slane %v1050_v35, 2  ;;  %v1209_v23 = vrot.slane %v1066_v29, 2  ;;  %v1076_v13 = vmul.f32 %v2083_v6, %v948_v59  ;;  %v2212_v35 = vld [vmem:[%s2507_s0 + $0x20] sm:$0xff]   ;;  %v2238_v28 = vld [vmem:[%s2507_s0 + $0x48] sm:$0xff]   ;;  %p1698_p9 = pnand %p1697_p8, %p1691_p5 }
  0xe8   :  { %v1052_v7 = vmul.f32 %v1613_v30, %v864_v32  ;;  %v1194_v17 = vsel %vm1122_vm6, %v1193_v40, %v1192_v22  ;;  %v1214_v25 = vsel %vm1110_vm2, %v1213_v50, %v1070_v56  ;;  %v1215_v24 = vrot.slane %v2095_v27, 6  ;;  %v1410_v29 = vld [vmem:[%s2507_s0] sm:$0xff]  }
  0xe9   :  { %v1615_v3 = vpop.eup %1614  ;;  %v1219_v1 = vrot.slane %v1078_v21, 4  ;;  %v975_v44 = vrot.slane %v974_v8, 1  ;;  %v1206_v55 = vsel %vm1119_vm5, %v1205_v34, %v1204_v14  ;;  %v969_v10 = vadd.f32 %v968_v42, %v967_v18  ;;  %v2223_v32 = vld [vmem:[%s2507_s0 + $0x40] sm:$0xff]   ;;  %v1509_v21 = vld [vmem:[%s2507_s0 + $0x28] sm:$0xff]  }
  0xea   :  { %v1617_v39 = vpop.eup %1616  ;;  %v1080_v41 = vmul.f32 %v1615_v3, %v962_v53  ;;  %v1197_v11 = vrot.slane %v1052_v7, 1  ;;  %v1208_v6 = vsel %vm1122_vm6, %v1207_v49, %v1206_v55  ;;  %v1196_v19 = vsel %vm1125_vm7, %v1195_v15, %v1194_v17  ;;  %v1505_v49 = vld [vmem:[%s2507_s0 + $0x8] sm:$0xff]   ;;  %v2233_v53 = vld [vmem:[%s2507_s0 + $0x10] sm:$0xff]  }
  0xeb   :  { %v1068_v47 = vmul.f32 %v1617_v39, %v920_v33  ;;  %v1210_v43 = vsel %vm1125_vm7, %v1209_v23, %v1208_v6  ;;  %v1216_v50 = vsel %vm1113_vm3, %v1215_v24, %v1214_v25  ;;  %v1217_v4 = vrot.slane %v1076_v13, 5  ;;  %v2243_v23 = vld [vmem:[%s2507_s0 + $0x30] sm:$0xff]  }
  0xec   :  { %v1198_v27 = vsel %vm1128_vm8, %v1197_v11, %v1196_v19  ;;  %v976_v46 = vadd.f32 %v975_v44, %v974_v8  ;;  %v1221_v5 = vrot.slane %v1080_v41, 3  ;;  %v1428_v18 = vunpack.c.h.bf16 %v2212_v35  ;;  %v2248_v3 = vld [vmem:[%s2507_s0 + $0x50] sm:$0xff]   ;;  %v2261_v41 = vld [vmem:[%s2507_s0 + $0x38] sm:$0xff]  }
  0xed   :  { %v1211_v31 = vrot.slane %v1068_v47, 1  ;;  %v1218_v34 = vsel %vm1116_vm4, %v1217_v4, %v1216_v50  ;;  %v1412_v57 = vunpack.c.h.bf16 %v1410_v29  ;;  %v1415_v8 = vunpack.c.l.bf16 %v1505_v49  ;;  %v2269_v19 = vld [vmem:[%s2507_s0 + $0x18] sm:$0xff]  }
  0xee   :  { %v1619_v26 = vpop.eup %1618  ;;  %v1220_v58 = vsel %vm1119_vm5, %v1219_v1, %v1218_v34  ;;  %v1444_v54 = vunpack.c.h.bf16 %v2223_v32  ;;  %v1431_v33 = vunpack.c.l.bf16 %v1509_v21  ;;  %v1416_v42 = vunpack.c.h.bf16 %v1505_v49 }
  0xef   :  { %v1212_v60 = vsel %vm1128_vm8, %v1211_v31, %v1210_v43  ;;  %v1082_v52 = vmul.f32 %v1619_v26, %v969_v10  ;;  %v1222_v48 = vsel %vm1122_vm6, %v1221_v5, %v1220_v58  ;;  %v1432_v22 = vunpack.c.h.bf16 %v1509_v21 }
  0xf0   :  { %v1561_v2 = vpack.i.bf16 %v1212_v60, %v1198_v27  ;;  %v1411_v7 = vunpack.c.l.bf16 %v1410_v29  ;;  %v1419_v17 = vunpack.c.l.bf16 %v2233_v53  ;;  %v1427_v25 = vunpack.c.l.bf16 %v2212_v35 }
  0xf1   :  { %v1223_v12 = vrot.slane %v1082_v52, 2  ;;  %v1443_v44 = vunpack.c.l.bf16 %v2223_v32  ;;  %v1447_v55 = vunpack.c.l.bf16 %v2238_v28  ;;  %v1420_v11 = vunpack.c.h.bf16 %v2233_v53 }
  0xf2   :  { %v1621_v51 = vpop.eup %1620  ;;  %1562 = vrot.lane.b32.xlu0 %v1561_v2, %s1715_s24  ;;  %v1435_v6 = vunpack.c.l.bf16 %v2243_v23  ;;  %v1451_v10 = vunpack.c.l.bf16 %v2248_v3  ;;  %v1448_v27 = vunpack.c.h.bf16 %v2238_v28  ;;  %v1436_v58 = vunpack.c.h.bf16 %v2243_v23 }
  0xf3   :  { %v1084_v38 = vmul.f32 %v1621_v51, %v976_v46  ;;  %v1224_v37 = vsel %vm1125_vm7, %v1223_v12, %v1222_v48  ;;  %v2526_v23 = vunpack.c.l.bf16 %v2269_v19 }
  0xf5   :  { %v1225_v59 = vrot.slane %v1084_v38, 1 }
  0xf7   :  { %v1226_v36 = vsel %vm1128_vm8, %v1225_v59, %v1224_v37 }
  0xf8   :  { %1231 = vrot.lane.b32.xlu1 %v1226_v36, %s1715_s24 }
  0xfc   :  { %v460_v16 = vpop.xlane.xlu0 %459 }
  0xfd   :  { %v2254_v24 = vmax.f32 %v460_v16, 1.0 }
  0xff   :  { %v477_v5 = vrot.slane %v2254_v24, 1  ;;  %v478_v36 = vrot.slane %v2254_v24, 2  ;;  %1622 = vrcp.f32 %v2254_v24 }
 0x100   :  { %v2207_v9 = vpop.xlane.xlu0 %462  ;;  %v457_v20 = vpop.xlane.xlu1 %456 }
 0x101   :  { %v2282_v38 = vmax.f32 %v457_v20, 1.0  ;;  %1624 = vrcp.f32 %v477_v5 }
 0x102   :  { %1626 = vrcp.f32 %v478_v36 }
 0x103   :  { %v473_v35 = vrot.slane %v2282_v38, 4 }
 0x104   :  { %v162_v61 = vpop.permute.xlu1 %161  ;;  %v106_v62 = vpop.permute.xlu0 %105 }
 0x105   :  { %v270_v14 = vmul.f32 %v1428_v18, %v162_v61  ;;  %v262_v30 = vmul.f32 %v1412_v57, %v106_v62  ;;  %v2289_v61 = vmax.f32 %v2207_v9, 1.0  ;;  %v470_v18 = vrot.slane %v2282_v38, 1 }
 0x107   :  { %v349_v43 = vsel %vm285_vm1, %v270_v14, 0.0  ;;  %v293_v50 = vsel %vm285_vm1, %v262_v30, 0.0  ;;  %v484_v30 = vrot.slane %v2289_v61, 1 }
 0x108   :  { %v113_v63 = vpop.permute.xlu1 %112  ;;  %v218_v56 = vpop.permute.xlu0 %217  ;;  %v350_v12 = vrot.slane %v349_v43, 4  ;;  %v294_v48 = vrot.slane %v293_v50, 4 }
 0x109   :  { %v263_v13 = vmul.f32 %v1415_v8, %v113_v63  ;;  %v278_v1 = vmul.f32 %v1444_v54, %v218_v56  ;;  %v471_v8 = vrot.slane %v2282_v38, 2 }
 0x10a   :  { %v351_v9 = vadd.f32 %v350_v12, %v349_v43  ;;  %v295_v57 = vadd.f32 %v294_v48, %v293_v50 }
 0x10b   :  { %v300_v31 = vsel %vm285_vm1, %v263_v13, 0.0  ;;  %v405_v2 = vsel %vm285_vm1, %v278_v1, 0.0 }
 0x10c   :  { %v169_v45 = vpop.permute.xlu1 %168  ;;  %v120_v40 = vpop.permute.xlu0 %119  ;;  %v301_v59 = vrot.slane %v300_v31, 4  ;;  %v406_v62 = vrot.slane %v405_v2, 4  ;;  %v296_v43 = vrot.slane %v295_v57, 2 }
 0x10d   :  { %v271_v47 = vmul.f32 %v1431_v33, %v169_v45  ;;  %v264_v4 = vmul.f32 %v1416_v42, %v120_v40  ;;  %v479_v45 = vrot.slane %v2254_v24, 3  ;;  %v2300_v40 = vld [vmem:[%s2507_s0 + $0x58] sm:$0xff]  }
 0x10e   :  { %v407_v42 = vadd.f32 %v406_v62, %v405_v2 }
 0x10f   :  { %v356_v37 = vsel %vm285_vm1, %v271_v47, 0.0  ;;  %v307_v16 = vsel %vm285_vm1, %v264_v4, 0.0  ;;  %1628 = vrcp.f32 %v479_v45  ;;  %v352_v47 = vrot.slane %v351_v9, 2 }
 0x110   :  { %v99_v0 = vpop.permute.xlu1 %98  ;;  %v176_v15 = vpop.permute.xlu0 %175  ;;  %v357_v29 = vrot.slane %v356_v37, 4  ;;  %v308_v21 = vrot.slane %v307_v16, 4  ;;  %1630 = vrcp.f32 %v470_v18 }
 0x111   :  { %v272_v46 = vmul.f32 %v1432_v22, %v176_v15  ;;  %v261_v26 = vmul.f32 %v1411_v7, %v99_v0  ;;  %v302_v0 = vadd.f32 %v301_v59, %v300_v31  ;;  %v472_v7 = vrot.slane %v2282_v38, 3 }
 0x112   :  { %v358_v13 = vadd.f32 %v357_v29, %v356_v37  ;;  %v309_v50 = vadd.f32 %v308_v21, %v307_v16  ;;  %1632 = vrcp.f32 %v471_v8  ;;  %v480_v59 = vrot.slane %v2254_v24, 4  ;;  %v2325_v21 = vpop.eup %1622 }
 0x113   :  { %v363_v63 = vsel %vm285_vm1, %v272_v46, 0.0  ;;  %v286_v20 = vsel %vm285_vm1, %v261_v26, 0.0  ;;  %v303_v4 = vrot.slane %v302_v0, 2  ;;  %1634 = vrcp.f32 %v484_v30 }
 0x114   :  { %v2252_v39 = vpop.permute.xlu1 %154  ;;  %v127_v52 = vpop.permute.xlu0 %126  ;;  %v364_v54 = vrot.slane %v363_v63, 4  ;;  %v287_v33 = vrot.slane %v286_v20, 4  ;;  %v408_v26 = vrot.slane %v407_v42, 2  ;;  %v359_v12 = vrot.slane %v358_v13, 2 }
 0x115   :  { %1636 = vrcp.f32 %v472_v7  ;;  %v265_v48 = vmul.f32 %v1419_v17, %v127_v52  ;;  %v353_v36 = vadd.f32 %v352_v47, %v351_v9  ;;  %v297_v16 = vadd.f32 %v296_v43, %v295_v57 }
 0x116   :  { %v365_v31 = vadd.f32 %v364_v54, %v363_v63  ;;  %v288_v46 = vadd.f32 %v287_v33, %v286_v20  ;;  %v310_v62 = vrot.slane %v309_v50, 2  ;;  %v269_v63 = vmul.f32 %v1427_v25, %v2252_v39 }
 0x117   :  { %v304_v29 = vadd.f32 %v303_v4, %v302_v0  ;;  %1638 = vrcp.f32 %v2282_v38  ;;  %v409_v17 = vadd.f32 %v408_v26, %v407_v42  ;;  %v360_v8 = vadd.f32 %v359_v12, %v358_v13  ;;  %v1625_v0 = vpop.eup %1624 }
 0x118   :  { %v2275_v60 = vpop.permute.xlu1 %224  ;;  %v2304_v14 = vpop.permute.xlu0 %210  ;;  %v366_v45 = vrot.slane %v365_v31, 2  ;;  %v289_v18 = vrot.slane %v288_v46, 2  ;;  %v314_v25 = vsel %vm285_vm1, %v265_v48, 0.0  ;;  %v485_v39 = vrot.slane %v2289_v61, 2 }
 0x119   :  { %v354_v54 = vrot.slane %v353_v36, 1  ;;  %v298_v33 = vrot.slane %v297_v16, 1  ;;  %v311_v30 = vadd.f32 %v310_v62, %v309_v50  ;;  %v342_v7 = vsel %vm285_vm1, %v269_v63, 0.0  ;;  %v1627_v9 = vpop.eup %1626 }
 0x11a   :  { %v305_v42 = vrot.slane %v304_v29, 1  ;;  %v367_v47 = vadd.f32 %v366_v45, %v365_v31  ;;  %v290_v43 = vadd.f32 %v289_v18, %v288_v46  ;;  %v474_v4 = vrot.slane %v2282_v38, 5 }
 0x11b   :  { %v410_v13 = vrot.slane %v409_v17, 1  ;;  %v315_v12 = vrot.slane %v314_v25, 4  ;;  %v361_v2 = vrot.slane %v360_v8, 1  ;;  %v343_v50 = vrot.slane %v342_v7, 4 }
 0x11c   :  { %v2293_v56 = vpop.permute.xlu1 %182  ;;  %v2316_v37 = vpop.permute.xlu0 %133  ;;  %v355_v63 = vadd.f32 %v354_v54, %v353_v36  ;;  %v299_v45 = vadd.f32 %v298_v33, %v297_v16  ;;  %v312_v18 = vrot.slane %v311_v30, 1  ;;  %v277_v15 = vmul.f32 %v1443_v44, %v2304_v14 }
 0x11d   :  { %v1629_v46 = vpop.eup %1628  ;;  %v306_v5 = vadd.f32 %v305_v42, %v304_v29  ;;  %v368_v48 = vrot.slane %v367_v47, 1  ;;  %v291_v51 = vrot.slane %v290_v43, 1  ;;  %v279_v1 = vmul.f32 %v1447_v55, %v2275_v60 }
 0x11e   :  { %v1631_v57 = vpop.eup %1630  ;;  %v411_v62 = vadd.f32 %v410_v13, %v409_v17  ;;  %1640 = vrcp.f32 %v473_v35  ;;  %v316_v31 = vadd.f32 %v315_v12, %v314_v25  ;;  %v488_v36 = vrot.slane %v2289_v61, 5 }
 0x11f   :  { %v1633_v34 = vpop.eup %1632  ;;  %v362_v54 = vadd.f32 %v361_v2, %v360_v8  ;;  %v344_v33 = vadd.f32 %v343_v50, %v342_v7  ;;  %1642 = vrcp.f32 %v2289_v61  ;;  %v490_v44 = vrot.slane %v2289_v61, 7 }
 0x120   :  { %v2307_v22 = vpop.permute.xlu1 %231  ;;  %v2335_v26 = vpop.permute.xlu0 %238  ;;  %v2352_v29 = vmul.f32 %v1625_v0, %v355_v63  ;;  %v518_v42 = vmul.f32 %v1631_v57, %v299_v45  ;;  %v313_v49 = vadd.f32 %v312_v18, %v311_v30  ;;  %v398_v55 = vsel %vm285_vm1, %v277_v15, 0.0 }
 0x121   :  { %v1635_v16 = vpop.eup %1634  ;;  %v2355_v17 = vmul.f32 %v1633_v34, %v306_v5  ;;  %v369_v35 = vadd.f32 %v368_v48, %v367_v47  ;;  %v292_v25 = vadd.f32 %v291_v51, %v290_v43  ;;  %v412_v2 = vsel %vm285_vm1, %v279_v1, 0.0 }
 0x122   :  { %v1637_v14 = vpop.eup %1636  ;;  %v2358_v7 = vmul.f32 %v1635_v16, %v411_v62  ;;  %v317_v13 = vrot.slane %v316_v31, 2  ;;  %1644 = vrcp.f32 %v485_v39  ;;  %v476_v12 = vrot.slane %v2282_v38, 7 }
 0x123   :  { %v2361_v0 = vmul.f32 %v1627_v9, %v362_v54  ;;  %v345_v57 = vrot.slane %v344_v33, 2  ;;  %v399_v30 = vrot.slane %v398_v55, 4  ;;  %1646 = vrcp.f32 %v474_v4 }
 0x124   :  { %v2322_v20 = vpop.permute.xlu1 %189  ;;  %v197_v32 = vpop.permute.xlu0 %196  ;;  %v1130_v15 = vrot.slane %v2352_v29, 7  ;;  %v1109_v34 = vrot.slane %v518_v42, 7  ;;  %v2364_v5 = vmul.f32 %v1637_v14, %v313_v49  ;;  %v413_v51 = vrot.slane %v412_v2, 4 }
 0x125   :  { %v1639_v8 = vpop.eup %1638  ;;  %v1112_v1 = vrot.slane %v2355_v17, 6  ;;  %v2367_v47 = vmul.f32 %v1629_v46, %v369_v35  ;;  %v280_v39 = vmul.f32 %v1448_v27, %v2307_v22  ;;  %v1144_v48 = vrot.slane %v2358_v7, 7 }
 0x126   :  { %v516_v43 = vmul.f32 %v1639_v8, %v292_v25  ;;  %v318_v50 = vadd.f32 %v317_v13, %v316_v31  ;;  %v266_v4 = vmul.f32 %v1420_v11, %v2316_v37  ;;  %v273_v49 = vmul.f32 %v1435_v6, %v2293_v56 }
 0x127   :  { %v1132_v46 = vrot.slane %v2361_v0, 6  ;;  %v346_v63 = vadd.f32 %v345_v57, %v344_v33  ;;  %v400_v45 = vadd.f32 %v399_v30, %v398_v55  ;;  %v274_v28 = vmul.f32 %v1436_v58, %v2322_v20 }
 0x128   :  { %v2339_v52 = vpop.permute.xlu1 %140  ;;  %v148_v9 = vpop.permute.xlu0 %147  ;;  %v414_v22 = vadd.f32 %v413_v51, %v412_v2  ;;  %1648 = vrcp.f32 %v480_v59  ;;  %v281_v53 = vmul.f32 %v1451_v10, %v2335_v26  ;;  %v1134_v11 = vrot.slane %v2367_v47, 5 }
 0x129   :  { %v2391_v6 = vsel %vm1110_vm2, %v1109_v34, %v516_v43  ;;  %v419_v56 = vsel %vm285_vm1, %v280_v39, 0.0  ;;  %v267_v58 = vmul.f32 %v2526_v23, %v2339_v52  ;;  %v319_v37 = vrot.slane %v318_v50, 1 }
 0x12a   :  { %v321_v20 = vsel %vm285_vm1, %v266_v4, 0.0  ;;  %v370_v59 = vsel %vm285_vm1, %v273_v49, 0.0  ;;  %v2527_v31 = vunpack.c.l.bf16 %v2261_v41  ;;  %v347_v26 = vrot.slane %v346_v63, 1 }
 0x12b   :  { %v2401_v10 = vpop.eup %1640  ;;  %v401_v16 = vrot.slane %v400_v45, 2  ;;  %v377_v54 = vsel %vm285_vm1, %v274_v28, 0.0  ;;  %v2528_v14 = vunpack.c.h.bf16 %v2248_v3  ;;  %v426_v52 = vsel %vm285_vm1, %v281_v53, 0.0 }
 0x12c   :  { %v246_v60 = vpop.permute.xlu1 %245  ;;  %v275_v18 = vmul.f32 %v2527_v31, %v197_v32  ;;  %v253_v33 = vpop.permute.xlu0 %252  ;;  %v420_v35 = vrot.slane %v419_v56, 4  ;;  %v2529_v25 = vunpack.c.h.bf16 %v2269_v19  ;;  %v2530_v32 = vunpack.c.h.bf16 %v2261_v41 }
 0x12d   :  { %v282_v42 = vmul.f32 %v2528_v14, %v246_v60  ;;  %v2406_v55 = vpop.eup %1642  ;;  %v415_v57 = vrot.slane %v414_v22, 2  ;;  %v322_v30 = vrot.slane %v321_v20, 4  ;;  %v371_v34 = vrot.slane %v370_v59, 4 }
 0x12e   :  { %v268_v2 = vmul.f32 %v2529_v25, %v148_v9  ;;  %v328_v51 = vsel %vm285_vm1, %v267_v58, 0.0  ;;  %v2531_v3 = vrot.slane %v2289_v61, 4  ;;  %v384_v60 = vsel %vm285_vm1, %v275_v18, 0.0 }
 0x12f   :  { %v378_v43 = vrot.slane %v377_v54, 4  ;;  %v2532_v39 = vunpack.c.l.bf16 %v2300_v40  ;;  %v2419_v19 = vpop.eup %1644  ;;  %v402_v9 = vadd.f32 %v401_v16, %v400_v45  ;;  %v427_v41 = vrot.slane %v426_v52, 4 }
 0x130   :  { %v204_v62 = vpop.permute.xlu1 %203  ;;  %1650 = vrcp.f32 %v2531_v3  ;;  %v433_v49 = vsel %vm285_vm1, %v282_v42, 0.0  ;;  %v2424_v53 = vpop.eup %1646  ;;  %v421_v23 = vadd.f32 %v420_v35, %v419_v56  ;;  %v335_v58 = vsel %vm285_vm1, %v268_v2, 0.0 }
 0x131   :  { %v276_v8 = vmul.f32 %v2530_v32, %v204_v62  ;;  %v283_v4 = vmul.f32 %v2532_v39, %v253_v33  ;;  %v2533_v62 = vunpack.c.h.bf16 %v2300_v40  ;;  %v329_v31 = vrot.slane %v328_v51, 4 }
 0x132   :  { %v2428_v14 = vadd.f32 %v319_v37, %v318_v50  ;;  %v416_v33 = vadd.f32 %v415_v57, %v414_v22  ;;  %v372_v25 = vadd.f32 %v371_v34, %v370_v59  ;;  %v385_v32 = vrot.slane %v384_v60, 4 }
 0x133   :  { %v391_v18 = vsel %vm285_vm1, %v276_v8, 0.0  ;;  %v323_v45 = vadd.f32 %v322_v30, %v321_v20  ;;  %v379_v16 = vadd.f32 %v378_v43, %v377_v54  ;;  %v440_v42 = vsel %vm285_vm1, %v283_v4, 0.0 }
 0x134   :  { %v260_v13 = vpop.permute.xlu1 %259  ;;  %v434_v3 = vrot.slane %v433_v49, 4  ;;  %v403_v40 = vrot.slane %v402_v9, 1  ;;  %v392_v39 = vrot.slane %v391_v18, 4  ;;  %v348_v35 = vadd.f32 %v347_v26, %v346_v63 }
 0x135   :  { %v284_v28 = vmul.f32 %v2533_v62, %v260_v13  ;;  %v336_v13 = vrot.slane %v335_v58, 4  ;;  %v428_v2 = vadd.f32 %v427_v41, %v426_v52  ;;  %v422_v62 = vrot.slane %v421_v23, 2  ;;  %v2432_v8 = vpop.eup %1648 }
 0x136   :  { %v330_v27 = vadd.f32 %v329_v31, %v328_v51  ;;  %v373_v50 = vrot.slane %v372_v25, 2  ;;  %v2534_v22 = vrot.slane %v2289_v61, 3  ;;  %v386_v37 = vadd.f32 %v385_v32, %v384_v60 }
 0x137   :  { %v447_v56 = vsel %vm285_vm1, %v284_v28, 0.0  ;;  %v441_v20 = vrot.slane %v440_v42, 4  ;;  %v417_v59 = vrot.slane %v416_v33, 1  ;;  %v380_v54 = vrot.slane %v379_v16, 2 }
 0x138   :  { %1652 = vrcp.f32 %v2534_v22  ;;  %v435_v57 = vadd.f32 %v434_v3, %v433_v49  ;;  %v448_v30 = vrot.slane %v447_v56, 4  ;;  %v404_v34 = vadd.f32 %v403_v40, %v402_v9 }
 0x139   :  { %v324_v43 = vrot.slane %v323_v45, 2  ;;  %v337_v4 = vadd.f32 %v336_v13, %v335_v58  ;;  %v393_v28 = vadd.f32 %v392_v39, %v391_v18  ;;  %v429_v63 = vrot.slane %v428_v2, 2 }
 0x13a   :  { %v423_v26 = vadd.f32 %v422_v62, %v421_v23  ;;  %v2535_v52 = vrot.slane %v2254_v24, 5  ;;  %v331_v51 = vrot.slane %v330_v27, 2  ;;  %v374_v41 = vadd.f32 %v373_v50, %v372_v25 }
 0x13b   :  { %v2536_v31 = vrot.slane %v2254_v24, 6  ;;  %v387_v60 = vrot.slane %v386_v37, 2  ;;  %v442_v32 = vadd.f32 %v441_v20, %v440_v42  ;;  %v381_v22 = vadd.f32 %v380_v54, %v379_v16 }
 0x13c   :  { %1654 = vrcp.f32 %v2535_v52  ;;  %v2537_v49 = vrot.slane %v2282_v38, 6  ;;  %v436_v9 = vrot.slane %v435_v57, 2  ;;  %v449_v3 = vadd.f32 %v448_v30, %v447_v56 }
 0x13d   :  { %1656 = vrcp.f32 %v2536_v31  ;;  %v1651_v58 = vpop.eup %1650  ;;  %v325_v18 = vadd.f32 %v324_v43, %v323_v45  ;;  %v338_v40 = vrot.slane %v337_v4, 2  ;;  %v394_v23 = vrot.slane %v393_v28, 2 }
 0x13e   :  { %1658 = vrcp.f32 %v2537_v49  ;;  %v430_v13 = vadd.f32 %v429_v63, %v428_v2  ;;  %v424_v25 = vrot.slane %v423_v26, 1  ;;  %v332_v39 = vadd.f32 %v331_v51, %v330_v27 }
 0x13f   :  { %1660 = vrcp.f32 %v488_v36  ;;  %v375_v42 = vrot.slane %v374_v41, 1  ;;  %v388_v16 = vadd.f32 %v387_v60, %v386_v37  ;;  %v443_v62 = vrot.slane %v442_v32, 2 }
 0x140   :  { %1662 = vrcp.f32 %v476_v12  ;;  %v2538_v50 = vrot.slane %v2254_v24, 7  ;;  %v418_v56 = vadd.f32 %v417_v59, %v416_v33  ;;  %v382_v20 = vrot.slane %v381_v22, 1 }
 0x141   :  { %v437_v45 = vadd.f32 %v436_v9, %v435_v57  ;;  %v450_v54 = vrot.slane %v449_v3, 2  ;;  %v326_v30 = vrot.slane %v325_v18, 1  ;;  %v339_v43 = vadd.f32 %v338_v40, %v337_v4 }
 0x142   :  { %1664 = vrcp.f32 %v2538_v50  ;;  %v2539_v36 = vrot.slane %v2289_v61, 6  ;;  %v395_v2 = vadd.f32 %v394_v23, %v393_v28  ;;  %v431_v27 = vrot.slane %v430_v13, 1 }
 0x143   :  { %v425_v63 = vadd.f32 %v424_v25, %v423_v26  ;;  %v333_v38 = vrot.slane %v332_v39, 1  ;;  %v2454_v24 = vmul.f32 %v2401_v10, %v2428_v14  ;;  %v376_v12 = vadd.f32 %v375_v42, %v374_v41 }
 0x144   :  { %1666 = vrcp.f32 %v2539_v36  ;;  %v389_v33 = vrot.slane %v388_v16, 1  ;;  %v444_v37 = vadd.f32 %v443_v62, %v442_v32  ;;  %v532_v57 = vmul.f32 %v2325_v21, %v348_v35 }
 0x145   :  { %1668 = vrcp.f32 %v490_v44  ;;  %v1653_v59 = vpop.eup %1652  ;;  %v383_v4 = vadd.f32 %v382_v20, %v381_v22  ;;  %v438_v52 = vrot.slane %v437_v45, 1  ;;  %v451_v51 = vadd.f32 %v450_v54, %v449_v3 }
 0x146   :  { %v552_v28 = vmul.f32 %v2419_v19, %v418_v56  ;;  %v327_v26 = vadd.f32 %v326_v30, %v325_v18  ;;  %v340_v31 = vrot.slane %v339_v43, 1  ;;  %v396_v60 = vrot.slane %v395_v2, 1 }
 0x147   :  { %v548_v61 = vmul.f32 %v2406_v55, %v404_v34  ;;  %v432_v44 = vadd.f32 %v431_v27, %v430_v13  ;;  %v554_v49 = vmul.f32 %v1653_v59, %v425_v63  ;;  %v334_v10 = vadd.f32 %v333_v38, %v332_v39 }
 0x148   :  { %v1118_v41 = vrot.slane %v2454_v24, 4  ;;  %v540_v32 = vmul.f32 %v2432_v8, %v376_v12  ;;  %v390_v9 = vadd.f32 %v389_v33, %v388_v16  ;;  %v445_v21 = vrot.slane %v444_v37, 1 }
 0x149   :  { %v1655_v14 = vpop.eup %1654  ;;  %v1131_v19 = vsel %vm1110_vm2, %v1130_v15, %v532_v57  ;;  %v439_v3 = vadd.f32 %v438_v52, %v437_v45  ;;  %v452_v18 = vrot.slane %v451_v51, 1  ;;  %v1146_v55 = vrot.slane %v552_v28, 6 }
 0x14a   :  { %v1657_v35 = vpop.eup %1656  ;;  %v542_v22 = vmul.f32 %v1655_v14, %v383_v4  ;;  %v526_v34 = vmul.f32 %v2424_v53, %v327_v26  ;;  %v341_v23 = vadd.f32 %v340_v31, %v339_v43  ;;  %v397_v13 = vadd.f32 %v396_v60, %v395_v2 }
 0x14b   :  { %v1659_v40 = vpop.eup %1658  ;;  %v1145_v8 = vsel %vm1110_vm2, %v1144_v48, %v548_v61  ;;  %v556_v39 = vmul.f32 %v1651_v58, %v432_v44  ;;  %v1148_v42 = vrot.slane %v554_v49, 5  ;;  %v1136_v62 = vrot.slane %v540_v32, 4 }
 0x14c   :  { %v1661_v25 = vpop.eup %1660  ;;  %v528_v16 = vmul.f32 %v1659_v40, %v334_v10  ;;  %v544_v15 = vmul.f32 %v1657_v35, %v390_v9  ;;  %v446_v50 = vadd.f32 %v445_v21, %v444_v37  ;;  %v1133_v56 = vsel %vm1113_vm3, %v1132_v46, %v1131_v19 }
 0x14d   :  { %v1663_v29 = vpop.eup %1662  ;;  %v1138_v53 = vrot.slane %v542_v22, 3  ;;  %v558_v45 = vmul.f32 %v1661_v25, %v439_v3  ;;  %v453_v54 = vadd.f32 %v452_v18, %v451_v51  ;;  %v1114_v7 = vsel %vm1113_vm3, %v1112_v1, %v2391_v6  ;;  %v1394_v22 = vld [vmem:[%s2512_s5] ss:$0 sm:$0xff] }
 0x14e   :  { %v1147_v48 = vsel %vm1113_vm3, %v1146_v55, %v1145_v8  ;;  %v1121_v58 = vrot.slane %v526_v34, 3  ;;  %v530_v30 = vmul.f32 %v1663_v29, %v341_v23  ;;  %v1150_v2 = vrot.slane %v556_v39, 4 }
 0x14f   :  { %v1665_v20 = vpop.eup %1664  ;;  %v1149_v0 = vsel %vm1116_vm4, %v1148_v42, %v1147_v48  ;;  %v1124_v27 = vrot.slane %v528_v16, 2  ;;  %v1135_v46 = vsel %vm1116_vm4, %v1134_v11, %v1133_v56  ;;  %v2540_v17 = vrot.slane %v2364_v5, 5 }
 0x150   :  { %v546_v43 = vmul.f32 %v1665_v20, %v397_v13  ;;  %v1137_v6 = vsel %vm1119_vm5, %v1136_v62, %v1135_v46  ;;  %v1140_v24 = vrot.slane %v544_v15, 2  ;;  %v1152_v12 = vrot.slane %v558_v45, 3 }
 0x151   :  { %v1667_v36 = vpop.eup %1666  ;;  %v1117_v1 = vsel %vm1116_vm4, %v2540_v17, %v1114_v7  ;;  %v1139_v59 = vsel %vm1122_vm6, %v1138_v53, %v1137_v6  ;;  %v1127_v47 = vrot.slane %v530_v30, 1  ;;  %v1151_v5 = vsel %vm1119_vm5, %v1150_v2, %v1149_v0 }
 0x152   :  { %v1669_v63 = vpop.eup %1668  ;;  %v560_v38 = vmul.f32 %v1667_v36, %v446_v50  ;;  %v1120_v37 = vsel %vm1119_vm5, %v1118_v41, %v1117_v1  ;;  %v1142_v4 = vrot.slane %v546_v43, 1  ;;  %v1141_v28 = vsel %vm1125_vm7, %v1140_v24, %v1139_v59 }
 0x153   :  { %v562_v33 = vmul.f32 %v1669_v63, %v453_v54  ;;  %v1123_v57 = vsel %vm1122_vm6, %v1121_v58, %v1120_v37  ;;  %v1153_v60 = vsel %vm1122_vm6, %v1152_v12, %v1151_v5 }
 0x154   :  { %v1126_v11 = vsel %vm1125_vm7, %v1124_v27, %v1123_v57  ;;  %v1154_v52 = vrot.slane %v560_v38, 2  ;;  %v1143_v49 = vsel %vm1128_vm8, %v1142_v4, %v1141_v28 }
 0x155   :  { %v1156_v61 = vrot.slane %v562_v33, 1  ;;  %v1129_v44 = vsel %vm1128_vm8, %v1127_v47, %v1126_v11 }
 0x156   :  { %v1155_v41 = vsel %vm1125_vm7, %v1154_v52, %v1153_v60 }
 0x157   :  { %v1157_v9 = vsel %vm1128_vm8, %v1156_v61, %v1155_v41 }
 0x164   :  { %v1563_v51 = vpop.permute.xlu0 %1562 }
 0x165   :  { %v1565_v26 = vunpack.i.h.bf16 %v1563_v51  ;;  %v1564_v31 = vunpack.i.l.bf16 %v1563_v51 }
 0x167   :  { %v1236_v10 = vsel %vm285_vm1, %v1129_v44, %v1564_v31  ;;  %v1237_v14 = vsel %vm285_vm1, %v1143_v49, %v1565_v26 }
 0x168   :  { %v1239_v32 = vpack.c.bf16 %v1237_v14, %v1236_v10 }
 0x16a   :  { %v1232_v21 = vpop.permute.xlu1 %1231  ;;  %1553 = vmatprep.mubr.bf16.mxu0 %v1239_v32 }
 0x16b   :  { %v1238_v35 = vsel %vm285_vm1, %v1157_v9, %v1232_v21 }
 0x16c   :  { %v1240_v19 = vpack.c.bf16 %v1238_v35, %v1238_v35 }
 0x16e   :  { %1554 = vmatmul.mubr.bf16.vlgmr.msra.gmra.mxu0 %v1240_v19 }
 0x22e   :  { %v1555_v3 = vpop.f32.mrf.mxu0 }
 0x22f   :  { %v1355_v18 = vadd.f32 %v1555_v3, %v1394_v22 }
 0x230   :  { %v1346_v40 = vpop.f32.mrf.mxu0 }
 0x231   :  { %v1408_v55 = vpack.c.bf16 %v1355_v18, %v1355_v18  ;;  %v1347_v34 = vadd.f32 %v1394_v22, %v1346_v40 }
 0x232   :  { %v1556_v23 = vpop.f32.mrf.mxu0 }
 0x233   :  { %1376 = vst.msk [vmem:[#allocation5 + $0x8] sm:$0xf] %vm1373_vm9, %v1408_v55  ;;  %v1406_v13 = vpack.c.bf16 %v1347_v34, %v1347_v34 }
 0x234   :  { %v1349_v25 = vpop.f32.mrf.mxu0 }
 0x235   :  { %1374 = vst.msk [vmem:[#allocation5] sm:$0xf] %vm1373_vm9, %v1406_v13  ;;  %v1350_v8 = vadd.f32 %v1394_v22, %v1349_v25 }
 0x237   :  { %v1407_v39 = vpack.c.bf16 %v1350_v8, %v1350_v8 }
 0x239   :  { %1375 = vst.msk [vmem:[#allocation5 + $0x4] sm:$0xf] %vm1373_vm9, %v1407_v39 }
 0x23a   :  { %1701 = shalt.err (!%p1698_p9)
}
 0x23b   :  { %1388 = dma.vmem_to_hbm [thread:$0]  %s1383_s4, 192, %s2513_s6, [#allocation4], %s1715_s24, %s1715_s24, %s1716_s25  }
 0x23c   :  { %1712 = dma.done.wait [#allocation4], 192  }
 0x23d   :  { %1713 = vsyncadd [#allocation4], 4294967104 }
 0x23e   :  { %1392 = vsyncpa [#allocation3], 1 }
 0x23f   :  { %1393 = vsyncpa [#allocation4], 1 }

</bundles_post_ra>
